<compile_context>
chip_gen: v7x
topology: tpu7x:2x2x1
jax: 0.10.0
libtpu: 0.0.40
codegen_flags: <defaults>
</compile_context>

<pallas_src>
from functools import partial

import jax
import jax.numpy as jnp
from jax.experimental import pallas as pl
from jax.experimental.pallas import tpu as pltpu

LANE = 128
SUBLANE = 8


def _ceil_to(x, m):
    return ((x + m - 1) // m) * m


# ------------------------------------------------------------------ kernels ---

def _gru_gates(x_bf16, h_f32, w_ih_ref, w_hh_ref, b_ih_ref, b_hh_ref):
    """Fused GRU cell math (PyTorch gate order r, z, n). bf16 MXU, f32 gates."""
    Hp = h_f32.shape[-1]
    gi = jnp.dot(x_bf16, w_ih_ref[...], preferred_element_type=jnp.float32) + b_ih_ref[...]
    gh = jnp.dot(h_f32.astype(jnp.bfloat16), w_hh_ref[...],
                 preferred_element_type=jnp.float32) + b_hh_ref[...]
    # Per-gate columns are lane-aligned (multiples of 128) -> free whole-vreg slices.
    i_r, i_z, i_n = gi[:, :Hp], gi[:, Hp:2 * Hp], gi[:, 2 * Hp:]
    h_r, h_z, h_n = gh[:, :Hp], gh[:, Hp:2 * Hp], gh[:, 2 * Hp:]
    r = jax.nn.sigmoid(i_r + h_r)
    z = jax.nn.sigmoid(i_z + h_z)
    n = jnp.tanh(i_n + r * h_n)
    return (1.0 - z) * n + z * h_f32


def encoder_gru_kernel(x_ref, w_ih_ref, w_hh_ref, b_ih_ref, b_hh_ref, h_ref):
    """One grid step = one encoder timestep; hidden carried in the (resident) output block."""
    @pl.when(pl.program_id(0) == 0)
    def _():
        h_ref[...] = jnp.zeros_like(h_ref)

    h_ref[...] = _gru_gates(x_ref[0], h_ref[...],
                            w_ih_ref, w_hh_ref, b_ih_ref, b_hh_ref)


def decoder_step_kernel(h0_ref, oh0_ref, emb_ref, w_ih_ref, w_hh_ref, b_ih_ref,
                        b_hh_ref, w_out_ref, b_out_ref, out_ref, h_scr, oh_scr,
                        *, n_valid_vocab):
    """One grid step = one greedy-decode token. hidden + token one-hot live in VMEM scratch."""
    @pl.when(pl.program_id(0) == 0)
    def _():
        h_scr[...] = h0_ref[...]
        oh_scr[...] = oh0_ref[...]

    # Embedding lookup inside the kernel: one_hot(token) @ embedding table (MXU).
    x = jnp.dot(oh_scr[...].astype(jnp.bfloat16), emb_ref[...],
                preferred_element_type=jnp.float32)                      # (Bp, Ep)

    h_new = _gru_gates(x.astype(jnp.bfloat16), h_scr[...],
                       w_ih_ref, w_hh_ref, b_ih_ref, b_hh_ref)           # (Bp, Hp) f32
    h_scr[...] = h_new

    # Output projection + masked log_softmax (padded vocab lanes neutralized).
    logits = jnp.dot(h_new.astype(jnp.bfloat16), w_out_ref[...],
                     preferred_element_type=jnp.float32) + b_out_ref[...]  # (Bp, Vp)
    lane = jax.lax.broadcasted_iota(jnp.int32, logits.shape, 1)
    logits = jnp.where(lane < n_valid_vocab, logits, jnp.float32(-1e30))

    m = jnp.max(logits, axis=-1, keepdims=True)
    s = logits - m
    lse = jnp.log(jnp.sum(jnp.exp(s), axis=-1, keepdims=True))
    out_ref[0] = s - lse

    # Greedy argmax (first max, matching torch.argmax) -> next-token one-hot.
    Vp = logits.shape[-1]
    idx = jnp.min(jnp.where(logits == m, lane, Vp), axis=-1, keepdims=True)
    oh_scr[...] = (lane == idx).astype(jnp.float32)


# ----------------------------------------------------------------- wrappers ---

def encoder_gru(x, w_ih, w_hh, b_ih, b_hh):
    """x: (S, Bp, Ep) bf16 pre-gathered embeddings -> final hidden (Bp, Hp) f32."""
    S, Bp, Ep = x.shape
    Hp = w_hh.shape[0]
    return pl.pallas_call(
        encoder_gru_kernel,
        out_shape=jax.ShapeDtypeStruct((Bp, Hp), jnp.float32),
        grid=(S,),
        in_specs=[
            pl.BlockSpec((1, Bp, Ep), lambda t: (t, 0, 0)),       # per-step embedding
            pl.BlockSpec((Ep, 3 * Hp), lambda t: (0, 0)),          # resident weights
            pl.BlockSpec((Hp, 3 * Hp), lambda t: (0, 0)),
            pl.BlockSpec((1, 3 * Hp), lambda t: (0, 0)),
            pl.BlockSpec((1, 3 * Hp), lambda t: (0, 0)),
        ],
        out_specs=pl.BlockSpec((Bp, Hp), lambda t: (0, 0)),        # resident carry
        compiler_params=pltpu.CompilerParams(dimension_semantics=("arbitrary",)),
    )(x, w_ih, w_hh, b_ih, b_hh)


def decoder_greedy(h0, init_oh, p, n_steps, out_vocab):
    """Runs n_steps greedy decode steps in one kernel. Returns (n_steps, Bp, Vp) log-probs."""
    Bp, Hp = h0.shape
    Vp = p["dec_w_out"].shape[1]
    Ep = p["dec_emb"].shape[1]
    kernel = partial(decoder_step_kernel, n_valid_vocab=out_vocab)
    return pl.pallas_call(
        kernel,
        out_shape=jax.ShapeDtypeStruct((n_steps, Bp, Vp), jnp.float32),
        grid=(n_steps,),
        in_specs=[
            pl.BlockSpec((Bp, Hp), lambda t: (0, 0)),              # h0
            pl.BlockSpec((Bp, Vp), lambda t: (0, 0)),              # initial one-hot token
            pl.BlockSpec((Vp, Ep), lambda t: (0, 0)),              # dec embedding table
            pl.BlockSpec((Ep, 3 * Hp), lambda t: (0, 0)),          # w_ih
            pl.BlockSpec((Hp, 3 * Hp), lambda t: (0, 0)),          # w_hh
            pl.BlockSpec((1, 3 * Hp), lambda t: (0, 0)),           # b_ih
            pl.BlockSpec((1, 3 * Hp), lambda t: (0, 0)),           # b_hh
            pl.BlockSpec((Hp, Vp), lambda t: (0, 0)),              # w_out
            pl.BlockSpec((1, Vp), lambda t: (0, 0)),               # b_out
        ],
        out_specs=pl.BlockSpec((1, Bp, Vp), lambda t: (t, 0, 0)),  # lane-dense per-step output
        scratch_shapes=[
            pltpu.VMEM((Bp, Hp), jnp.float32),                     # hidden carry
            pltpu.VMEM((Bp, Vp), jnp.float32),                     # token one-hot carry
        ],
        compiler_params=pltpu.CompilerParams(dimension_semantics=("arbitrary",)),
    )(h0, init_oh, p["dec_emb"], p["dec_w_ih"], p["dec_w_hh"],
      p["dec_b_ih"], p["dec_b_hh"], p["dec_w_out"], p["dec_b_out"])


# ------------------------------------------------------------------- params ---

def init_params(key, src_vocab, out_vocab, emb_dim, hidden):
    """Weights stored pre-transposed ((in, out) layout) and padded to lane/sublane tiles."""
    Ep = _ceil_to(emb_dim, LANE)
    Hp = _ceil_to(hidden, LANE)
    Vp = _ceil_to(out_vocab, LANE)
    ks = jax.random.split(key, 7)
    scale = 0.1

    def pad2(a, r, c):
        return jnp.pad(a, ((0, r - a.shape[0]), (0, c - a.shape[1])))

    def gru_w(k, in_dim, in_pad):
        kk = jax.random.split(k, 3)  # gates r, z, n — each padded to a lane-aligned Hp block
        gates = [pad2(scale * jax.random.normal(q, (in_dim, hidden), jnp.float32), in_pad, Hp)
                 for q in kk]
        return jnp.concatenate(gates, axis=1).astype(jnp.bfloat16)   # (in_pad, 3*Hp)

    return {
        "enc_emb": pad2(scale * jax.random.normal(ks[0], (src_vocab, emb_dim), jnp.float32),
                        src_vocab, Ep).astype(jnp.bfloat16),
        "enc_w_ih": gru_w(ks[1], emb_dim, Ep),
        "enc_w_hh": gru_w(ks[2], hidden, Hp),
        "enc_b_ih": jnp.zeros((1, 3 * Hp), jnp.float32),
        "enc_b_hh": jnp.zeros((1, 3 * Hp), jnp.float32),
        "dec_emb": pad2(scale * jax.random.normal(ks[3], (out_vocab, emb_dim), jnp.float32),
                        Vp, Ep).astype(jnp.bfloat16),
        "dec_w_ih": gru_w(ks[4], emb_dim, Ep),
        "dec_w_hh": gru_w(ks[5], hidden, Hp),
        "dec_b_ih": jnp.zeros((1, 3 * Hp), jnp.float32),
        "dec_b_hh": jnp.zeros((1, 3 * Hp), jnp.float32),
        "dec_w_out": pad2(scale * jax.random.normal(ks[6], (hidden, out_vocab), jnp.float32),
                          Hp, Vp).astype(jnp.bfloat16),
        "dec_b_out": jnp.zeros((1, Vp), jnp.float32),
    }


# ------------------------------------------------------------------ forward ---

@partial(jax.jit, static_argnames=("out_vocab", "out_seq_len"))
def seq2seq_forward(p, source, out_vocab, out_seq_len=None):
    """Mirrors Seq2Seq.forward: greedy decode, outputs concatenated along dim 0."""
    B, S = source.shape
    if out_seq_len is None:
        out_seq_len = S
    Vp = p["dec_w_out"].shape[1]
    Bp = _ceil_to(B, SUBLANE)

    # Encoder: embedding gather is vectorized JAX glue; GRU time loop is one kernel.
    x = jnp.take(p["enc_emb"], source, axis=0)        # (B, S, Ep) bf16
    x = jnp.transpose(x, (1, 0, 2))                   # (S, B, Ep)
    x = jnp.pad(x, ((0, 0), (0, Bp - B), (0, 0)))     # (S, Bp, Ep)
    h_enc = encoder_gru(x, p["enc_w_ih"], p["enc_w_hh"], p["enc_b_ih"], p["enc_b_hh"])

    outputs0 = jnp.zeros((B, out_vocab), jnp.float32)
    if out_seq_len <= 1:
        return outputs0

    # Decoder: whole greedy loop inside one kernel. Initial token = source[:, 0] (as one-hot).
    init_oh = jax.nn.one_hot(source[:, 0], Vp, dtype=jnp.float32)
    init_oh = jnp.pad(init_oh, ((0, Bp - B), (0, 0)))
    dec_out = decoder_greedy(h_enc, init_oh, p, out_seq_len - 1, out_vocab)  # (T-1, Bp, Vp)
    dec_out = dec_out[:, :B, :out_vocab].reshape((out_seq_len - 1) * B, out_vocab)

    # torch.cat default dim=0 -> (out_seq_len * batch_size, output_size)
    return jnp.concatenate([outputs0, dec_out], axis=0)


# -------------------------------------------------------------------- main ----

if __name__ == "__main__":
    SRC_VOCAB = 16
    OUT_VOCAB = 16
    EMB_DIM = 32
    HIDDEN = 32
    BATCH = 2
    SEQ = 8

    params = init_params(jax.random.PRNGKey(42), SRC_VOCAB, OUT_VOCAB, EMB_DIM, HIDDEN)

    key = jax.random.PRNGKey(0)
    source = jax.random.randint(key, (BATCH, SEQ), 0, SRC_VOCAB, dtype=jnp.int32)

    out = seq2seq_forward(params, source, out_vocab=OUT_VOCAB)
    out = jax.block_until_ready(out)

    assert out.shape == (SEQ * BATCH, OUT_VOCAB), out.shape
    assert bool(jnp.all(jnp.isfinite(out)))
    print("KERNEL_OK")
</pallas_src>

<mosaic_0001>
module attributes {stable_mosaic.version = 11 : i64} {
  func.func @encoder_gru_kernel(%arg0: i32, %arg1: memref<1x8x128xbf16, #tpu.memory_space<vmem>>, %arg2: memref<128x384xbf16, #tpu.memory_space<vmem>>, %arg3: memref<128x384xbf16, #tpu.memory_space<vmem>>, %arg4: memref<1x384xf32, #tpu.memory_space<vmem>>, %arg5: memref<1x384xf32, #tpu.memory_space<vmem>>, %arg6: memref<8x128xf32, #tpu.memory_space<vmem>>) attributes {dimension_semantics = [#tpu.dimension_semantics<arbitrary>], iteration_bounds = array<i64: 8>, scalar_prefetch = 0 : i64, scratch_operands = 0 : i64, tpu.core_type = #tpu.core_type<tc>, window_params = [{transform_indices = @transform_0, window_bounds = array<i64: 1, 8, 128>}, {pipeline_mode = #tpu.pipeline_mode<synchronous>, transform_indices = @transform_1, window_bounds = array<i64: 128, 384>}, {pipeline_mode = #tpu.pipeline_mode<synchronous>, transform_indices = @transform_2, window_bounds = array<i64: 128, 384>}, {pipeline_mode = #tpu.pipeline_mode<synchronous>, transform_indices = @transform_3, window_bounds = array<i64: 1, 384>}, {pipeline_mode = #tpu.pipeline_mode<synchronous>, transform_indices = @transform_4, window_bounds = array<i64: 1, 384>}, {pipeline_mode = #tpu.pipeline_mode<synchronous>, transform_indices = @transform_5, window_bounds = array<i64: 8, 128>}]} {
    %c0_i32 = arith.constant 0 : i32
    %0 = arith.cmpi eq, %arg0, %c0_i32 : i32
    %1 = arith.extui %0 : i1 to i32
    %c0_i32_0 = arith.constant 0 : i32
    %2 = arith.cmpi ne, %1, %c0_i32_0 : i32
    scf.if %2 {
      %cst_19 = arith.constant 0.000000e+00 : f32
      %44 = vector.broadcast %cst_19 : f32 to vector<8x128xf32>
      %c0_20 = arith.constant 0 : index
      %c0_21 = arith.constant 0 : index
      %45 = vector.load %arg6[%c0_20, %c0_21] : memref<8x128xf32, #tpu.memory_space<vmem>>, vector<8x128xf32>
      tpu.vector_store %arg6[%c0_20, %c0_21], %44 {strides = array<i32>} : memref<8x128xf32, #tpu.memory_space<vmem>>, vector<8x128xf32>,
    } else {
    }
    %c0 = arith.constant 0 : index
    %c0_1 = arith.constant 0 : index
    %c0_2 = arith.constant 0 : index
    %3 = vector.load %arg1[%c0, %c0_1, %c0_2] : memref<1x8x128xbf16, #tpu.memory_space<vmem>>, vector<1x8x128xbf16>
    %4 = vector.shape_cast %3 : vector<1x8x128xbf16> to vector<8x128xbf16>
    %c0_3 = arith.constant 0 : index
    %c0_4 = arith.constant 0 : index
    %5 = vector.load %arg6[%c0_3, %c0_4] : memref<8x128xf32, #tpu.memory_space<vmem>>, vector<8x128xf32>
    %c0_5 = arith.constant 0 : index
    %c0_6 = arith.constant 0 : index
    %6 = vector.load %arg2[%c0_5, %c0_6] : memref<128x384xbf16, #tpu.memory_space<vmem>>, vector<128x384xbf16>
    %cst = arith.constant dense<0.000000e+00> : vector<8x384xf32>
    %7 = tpu.matmul %4, %6, %cst {dimension_numbers = #tpu.dot_dimension_numbers<[1], [0], [0], [1], [0, 0, 1, 1], [], []>} : vector<8x128xbf16>, vector<128x384xbf16>, vector<8x384xf32> -> vector<8x384xf32>
    %c0_7 = arith.constant 0 : index
    %c0_8 = arith.constant 0 : index
    %8 = vector.load %arg4[%c0_7, %c0_8] : memref<1x384xf32, #tpu.memory_space<vmem>>, vector<1x384xf32>
    %9 = vector.broadcast %8 : vector<1x384xf32> to vector<8x384xf32>
    %10 = arith.addf %7, %9 : vector<8x384xf32>
    %11 = arith.truncf %5 : vector<8x128xf32> to vector<8x128xbf16>
    %c0_9 = arith.constant 0 : index
    %c0_10 = arith.constant 0 : index
    %12 = vector.load %arg3[%c0_9, %c0_10] : memref<128x384xbf16, #tpu.memory_space<vmem>>, vector<128x384xbf16>
    %cst_11 = arith.constant dense<0.000000e+00> : vector<8x384xf32>
    %13 = tpu.matmul %11, %12, %cst_11 {dimension_numbers = #tpu.dot_dimension_numbers<[1], [0], [0], [1], [0, 0, 1, 1], [], []>} : vector<8x128xbf16>, vector<128x384xbf16>, vector<8x384xf32> -> vector<8x384xf32>
    %c0_12 = arith.constant 0 : index
    %c0_13 = arith.constant 0 : index
    %14 = vector.load %arg5[%c0_12, %c0_13] : memref<1x384xf32, #tpu.memory_space<vmem>>, vector<1x384xf32>
    %15 = vector.broadcast %14 : vector<1x384xf32> to vector<8x384xf32>
    %16 = arith.addf %13, %15 : vector<8x384xf32>
    %17 = vector.extract_strided_slice %10 {offsets = [0, 0], sizes = [8, 128], strides = [1, 1]} : vector<8x384xf32> to vector<8x128xf32>
    %18 = vector.extract_strided_slice %10 {offsets = [0, 128], sizes = [8, 128], strides = [1, 1]} : vector<8x384xf32> to vector<8x128xf32>
    %19 = vector.extract_strided_slice %10 {offsets = [0, 256], sizes = [8, 128], strides = [1, 1]} : vector<8x384xf32> to vector<8x128xf32>
    %20 = vector.extract_strided_slice %16 {offsets = [0, 0], sizes = [8, 128], strides = [1, 1]} : vector<8x384xf32> to vector<8x128xf32>
    %21 = vector.extract_strided_slice %16 {offsets = [0, 128], sizes = [8, 128], strides = [1, 1]} : vector<8x384xf32> to vector<8x128xf32>
    %22 = vector.extract_strided_slice %16 {offsets = [0, 256], sizes = [8, 128], strides = [1, 1]} : vector<8x384xf32> to vector<8x128xf32>
    %23 = arith.addf %17, %20 : vector<8x128xf32>
    %24 = arith.negf %23 : vector<8x128xf32>
    %25 = math.exp %24 : vector<8x128xf32>
    %cst_14 = arith.constant 1.000000e+00 : f32
    %26 = vector.broadcast %cst_14 : f32 to vector<8x128xf32>
    %27 = arith.addf %26, %25 : vector<8x128xf32>
    %28 = arith.divf %26, %27 : vector<8x128xf32>
    %29 = arith.addf %18, %21 : vector<8x128xf32>
    %30 = arith.negf %29 : vector<8x128xf32>
    %31 = math.exp %30 : vector<8x128xf32>
    %cst_15 = arith.constant 1.000000e+00 : f32
    %32 = vector.broadcast %cst_15 : f32 to vector<8x128xf32>
    %33 = arith.addf %32, %31 : vector<8x128xf32>
    %34 = arith.divf %32, %33 : vector<8x128xf32>
    %35 = arith.mulf %28, %22 : vector<8x128xf32>
    %36 = arith.addf %19, %35 : vector<8x128xf32>
    %37 = math.tanh %36 : vector<8x128xf32>
    %cst_16 = arith.constant 1.000000e+00 : f32
    %38 = vector.broadcast %cst_16 : f32 to vector<8x128xf32>
    %39 = arith.subf %38, %34 : vector<8x128xf32>
    %40 = arith.mulf %39, %37 : vector<8x128xf32>
    %41 = arith.mulf %34, %5 : vector<8x128xf32>
    %42 = arith.addf %40, %41 : vector<8x128xf32>
    %c0_17 = arith.constant 0 : index
    %c0_18 = arith.constant 0 : index
    %43 = vector.load %arg6[%c0_17, %c0_18] : memref<8x128xf32, #tpu.memory_space<vmem>>, vector<8x128xf32>
    tpu.vector_store %arg6[%c0_17, %c0_18], %42 {strides = array<i32>} : memref<8x128xf32, #tpu.memory_space<vmem>>, vector<8x128xf32>,
    return
  }
  func.func @transform_0(%arg0: i32) -> (i32, i32, i32) {
    %c0_i32 = arith.constant 0 : i32
    %c0_i32_0 = arith.constant 0 : i32
    %c0_i32_1 = arith.constant 0 : i32
    return %arg0, %c0_i32, %c0_i32_0 : i32, i32, i32
  }
  func.func @transform_1(%arg0: i32) -> (i32, i32) {
    %c0_i32 = arith.constant 0 : i32
    %c0_i32_0 = arith.constant 0 : i32
    %c0_i32_1 = arith.constant 0 : i32
    return %c0_i32, %c0_i32_0 : i32, i32
  }
  func.func @transform_2(%arg0: i32) -> (i32, i32) {
    %c0_i32 = arith.constant 0 : i32
    %c0_i32_0 = arith.constant 0 : i32
    %c0_i32_1 = arith.constant 0 : i32
    return %c0_i32, %c0_i32_0 : i32, i32
  }
  func.func @transform_3(%arg0: i32) -> (i32, i32) {
    %c0_i32 = arith.constant 0 : i32
    %c0_i32_0 = arith.constant 0 : i32
    %c0_i32_1 = arith.constant 0 : i32
    return %c0_i32, %c0_i32_0 : i32, i32
  }
  func.func @transform_4(%arg0: i32) -> (i32, i32) {
    %c0_i32 = arith.constant 0 : i32
    %c0_i32_0 = arith.constant 0 : i32
    %c0_i32_1 = arith.constant 0 : i32
    return %c0_i32, %c0_i32_0 : i32, i32
  }
  func.func @transform_5(%arg0: i32) -> (i32, i32) {
    %c0_i32 = arith.constant 0 : i32
    %c0_i32_0 = arith.constant 0 : i32
    %c0_i32_1 = arith.constant 0 : i32
    return %c0_i32, %c0_i32_0 : i32, i32
  }
}

module attributes {stable_mosaic.version = 11 : i64} {
  func.func @decoder_step_kernel(%arg0: i32, %arg1: memref<8x128xf32, #tpu.memory_space<vmem>>, %arg2: memref<8x128xf32, #tpu.memory_space<vmem>>, %arg3: memref<128x128xbf16, #tpu.memory_space<vmem>>, %arg4: memref<128x384xbf16, #tpu.memory_space<vmem>>, %arg5: memref<128x384xbf16, #tpu.memory_space<vmem>>, %arg6: memref<1x384xf32, #tpu.memory_space<vmem>>, %arg7: memref<1x384xf32, #tpu.memory_space<vmem>>, %arg8: memref<128x128xbf16, #tpu.memory_space<vmem>>, %arg9: memref<1x128xf32, #tpu.memory_space<vmem>>, %arg10: memref<1x8x128xf32, #tpu.memory_space<vmem>>, %arg11: memref<8x128xf32, #tpu.memory_space<vmem>>, %arg12: memref<8x128xf32, #tpu.memory_space<vmem>>) attributes {dimension_semantics = [#tpu.dimension_semantics<arbitrary>], iteration_bounds = array<i64: 7>, scalar_prefetch = 0 : i64, scratch_operands = 2 : i64, tpu.core_type = #tpu.core_type<tc>, window_params = [{pipeline_mode = #tpu.pipeline_mode<synchronous>, transform_indices = @transform_0, window_bounds = array<i64: 8, 128>}, {pipeline_mode = #tpu.pipeline_mode<synchronous>, transform_indices = @transform_1, window_bounds = array<i64: 8, 128>}, {pipeline_mode = #tpu.pipeline_mode<synchronous>, transform_indices = @transform_2, window_bounds = array<i64: 128, 128>}, {pipeline_mode = #tpu.pipeline_mode<synchronous>, transform_indices = @transform_3, window_bounds = array<i64: 128, 384>}, {pipeline_mode = #tpu.pipeline_mode<synchronous>, transform_indices = @transform_4, window_bounds = array<i64: 128, 384>}, {pipeline_mode = #tpu.pipeline_mode<synchronous>, transform_indices = @transform_5, window_bounds = array<i64: 1, 384>}, {pipeline_mode = #tpu.pipeline_mode<synchronous>, transform_indices = @transform_6, window_bounds = array<i64: 1, 384>}, {pipeline_mode = #tpu.pipeline_mode<synchronous>, transform_indices = @transform_7, window_bounds = array<i64: 128, 128>}, {pipeline_mode = #tpu.pipeline_mode<synchronous>, transform_indices = @transform_8, window_bounds = array<i64: 1, 128>}, {transform_indices = @transform_9, window_bounds = array<i64: 1, 8, 128>}]} {
    %c0_i32 = arith.constant 0 : i32
    %0 = arith.cmpi eq, %arg0, %c0_i32 : i32
    %1 = arith.extui %0 : i1 to i32
    %c0_i32_0 = arith.constant 0 : i32
    %2 = arith.cmpi ne, %1, %c0_i32_0 : i32
    scf.if %2 {
      %c0_35 = arith.constant 0 : index
      %c0_36 = arith.constant 0 : index
      %82 = vector.load %arg1[%c0_35, %c0_36] : memref<8x128xf32, #tpu.memory_space<vmem>>, vector<8x128xf32>
      %c0_37 = arith.constant 0 : index
      %c0_38 = arith.constant 0 : index
      %83 = vector.load %arg11[%c0_37, %c0_38] : memref<8x128xf32, #tpu.memory_space<vmem>>, vector<8x128xf32>
      tpu.vector_store %arg11[%c0_37, %c0_38], %82 {strides = array<i32>} : memref<8x128xf32, #tpu.memory_space<vmem>>, vector<8x128xf32>,
      %c0_39 = arith.constant 0 : index
      %c0_40 = arith.constant 0 : index
      %84 = vector.load %arg2[%c0_39, %c0_40] : memref<8x128xf32, #tpu.memory_space<vmem>>, vector<8x128xf32>
      %c0_41 = arith.constant 0 : index
      %c0_42 = arith.constant 0 : index
      %85 = vector.load %arg12[%c0_41, %c0_42] : memref<8x128xf32, #tpu.memory_space<vmem>>, vector<8x128xf32>
      tpu.vector_store %arg12[%c0_41, %c0_42], %84 {strides = array<i32>} : memref<8x128xf32, #tpu.memory_space<vmem>>, vector<8x128xf32>,
    } else {
    }
    %c0 = arith.constant 0 : index
    %c0_1 = arith.constant 0 : index
    %3 = vector.load %arg12[%c0, %c0_1] : memref<8x128xf32, #tpu.memory_space<vmem>>, vector<8x128xf32>
    %4 = arith.truncf %3 : vector<8x128xf32> to vector<8x128xbf16>
    %c0_2 = arith.constant 0 : index
    %c0_3 = arith.constant 0 : index
    %5 = vector.load %arg3[%c0_2, %c0_3] : memref<128x128xbf16, #tpu.memory_space<vmem>>, vector<128x128xbf16>
    %cst = arith.constant dense<0.000000e+00> : vector<8x128xf32>
    %6 = tpu.matmul %4, %5, %cst {dimension_numbers = #tpu.dot_dimension_numbers<[1], [0], [0], [1], [0, 0, 1, 1], [], []>} : vector<8x128xbf16>, vector<128x128xbf16>, vector<8x128xf32> -> vector<8x128xf32>
    %7 = arith.truncf %6 : vector<8x128xf32> to vector<8x128xbf16>
    %c0_4 = arith.constant 0 : index
    %c0_5 = arith.constant 0 : index
    %8 = vector.load %arg11[%c0_4, %c0_5] : memref<8x128xf32, #tpu.memory_space<vmem>>, vector<8x128xf32>
    %c0_6 = arith.constant 0 : index
    %c0_7 = arith.constant 0 : index
    %9 = vector.load %arg4[%c0_6, %c0_7] : memref<128x384xbf16, #tpu.memory_space<vmem>>, vector<128x384xbf16>
    %cst_8 = arith.constant dense<0.000000e+00> : vector<8x384xf32>
    %10 = tpu.matmul %7, %9, %cst_8 {dimension_numbers = #tpu.dot_dimension_numbers<[1], [0], [0], [1], [0, 0, 1, 1], [], []>} : vector<8x128xbf16>, vector<128x384xbf16>, vector<8x384xf32> -> vector<8x384xf32>
    %c0_9 = arith.constant 0 : index
    %c0_10 = arith.constant 0 : index
    %11 = vector.load %arg6[%c0_9, %c0_10] : memref<1x384xf32, #tpu.memory_space<vmem>>, vector<1x384xf32>
    %12 = vector.broadcast %11 : vector<1x384xf32> to vector<8x384xf32>
    %13 = arith.addf %10, %12 : vector<8x384xf32>
    %14 = arith.truncf %8 : vector<8x128xf32> to vector<8x128xbf16>
    %c0_11 = arith.constant 0 : index
    %c0_12 = arith.constant 0 : index
    %15 = vector.load %arg5[%c0_11, %c0_12] : memref<128x384xbf16, #tpu.memory_space<vmem>>, vector<128x384xbf16>
    %cst_13 = arith.constant dense<0.000000e+00> : vector<8x384xf32>
    %16 = tpu.matmul %14, %15, %cst_13 {dimension_numbers = #tpu.dot_dimension_numbers<[1], [0], [0], [1], [0, 0, 1, 1], [], []>} : vector<8x128xbf16>, vector<128x384xbf16>, vector<8x384xf32> -> vector<8x384xf32>
    %c0_14 = arith.constant 0 : index
    %c0_15 = arith.constant 0 : index
    %17 = vector.load %arg7[%c0_14, %c0_15] : memref<1x384xf32, #tpu.memory_space<vmem>>, vector<1x384xf32>
    %18 = vector.broadcast %17 : vector<1x384xf32> to vector<8x384xf32>
    %19 = arith.addf %16, %18 : vector<8x384xf32>
    %20 = vector.extract_strided_slice %13 {offsets = [0, 0], sizes = [8, 128], strides = [1, 1]} : vector<8x384xf32> to vector<8x128xf32>
    %21 = vector.extract_strided_slice %13 {offsets = [0, 128], sizes = [8, 128], strides = [1, 1]} : vector<8x384xf32> to vector<8x128xf32>
    %22 = vector.extract_strided_slice %13 {offsets = [0, 256], sizes = [8, 128], strides = [1, 1]} : vector<8x384xf32> to vector<8x128xf32>
    %23 = vector.extract_strided_slice %19 {offsets = [0, 0], sizes = [8, 128], strides = [1, 1]} : vector<8x384xf32> to vector<8x128xf32>
    %24 = vector.extract_strided_slice %19 {offsets = [0, 128], sizes = [8, 128], strides = [1, 1]} : vector<8x384xf32> to vector<8x128xf32>
    %25 = vector.extract_strided_slice %19 {offsets = [0, 256], sizes = [8, 128], strides = [1, 1]} : vector<8x384xf32> to vector<8x128xf32>
    %26 = arith.addf %20, %23 : vector<8x128xf32>
    %27 = arith.negf %26 : vector<8x128xf32>
    %28 = math.exp %27 : vector<8x128xf32>
    %cst_16 = arith.constant 1.000000e+00 : f32
    %29 = vector.broadcast %cst_16 : f32 to vector<8x128xf32>
    %30 = arith.addf %29, %28 : vector<8x128xf32>
    %31 = arith.divf %29, %30 : vector<8x128xf32>
    %32 = arith.addf %21, %24 : vector<8x128xf32>
    %33 = arith.negf %32 : vector<8x128xf32>
    %34 = math.exp %33 : vector<8x128xf32>
    %cst_17 = arith.constant 1.000000e+00 : f32
    %35 = vector.broadcast %cst_17 : f32 to vector<8x128xf32>
    %36 = arith.addf %35, %34 : vector<8x128xf32>
    %37 = arith.divf %35, %36 : vector<8x128xf32>
    %38 = arith.mulf %31, %25 : vector<8x128xf32>
    %39 = arith.addf %22, %38 : vector<8x128xf32>
    %40 = math.tanh %39 : vector<8x128xf32>
    %cst_18 = arith.constant 1.000000e+00 : f32
    %41 = vector.broadcast %cst_18 : f32 to vector<8x128xf32>
    %42 = arith.subf %41, %37 : vector<8x128xf32>
    %43 = arith.mulf %42, %40 : vector<8x128xf32>
    %44 = arith.mulf %37, %8 : vector<8x128xf32>
    %45 = arith.addf %43, %44 : vector<8x128xf32>
    %c0_19 = arith.constant 0 : index
    %c0_20 = arith.constant 0 : index
    %46 = vector.load %arg11[%c0_19, %c0_20] : memref<8x128xf32, #tpu.memory_space<vmem>>, vector<8x128xf32>
    tpu.vector_store %arg11[%c0_19, %c0_20], %45 {strides = array<i32>} : memref<8x128xf32, #tpu.memory_space<vmem>>, vector<8x128xf32>,
    %47 = arith.truncf %45 : vector<8x128xf32> to vector<8x128xbf16>
    %c0_21 = arith.constant 0 : index
    %c0_22 = arith.constant 0 : index
    %48 = vector.load %arg8[%c0_21, %c0_22] : memref<128x128xbf16, #tpu.memory_space<vmem>>, vector<128x128xbf16>
    %cst_23 = arith.constant dense<0.000000e+00> : vector<8x128xf32>
    %49 = tpu.matmul %47, %48, %cst_23 {dimension_numbers = #tpu.dot_dimension_numbers<[1], [0], [0], [1], [0, 0, 1, 1], [], []>} : vector<8x128xbf16>, vector<128x128xbf16>, vector<8x128xf32> -> vector<8x128xf32>
    %c0_24 = arith.constant 0 : index
    %c0_25 = arith.constant 0 : index
    %50 = vector.load %arg9[%c0_24, %c0_25] : memref<1x128xf32, #tpu.memory_space<vmem>>, vector<1x128xf32>
    %51 = vector.broadcast %50 : vector<1x128xf32> to vector<8x128xf32>
    %52 = arith.addf %49, %51 : vector<8x128xf32>
    %53 = tpu.iota {dimensions = array<i32: 1>} : vector<8x128xi32>
    %c16_i32 = arith.constant 16 : i32
    %54 = vector.broadcast %c16_i32 : i32 to vector<8x128xi32>
    %55 = arith.cmpi slt, %53, %54 : vector<8x128xi32>
    %cst_26 = arith.constant -1.000000e+30 : f32
    %56 = vector.broadcast %cst_26 : f32 to vector<8x128xf32>
    %57 = arith.select %55, %52, %56 : vector<8x128xi1>, vector<8x128xf32>
    %cst_27 = arith.constant dense<0xFF800000> : vector<8xf32>
    %58 = vector.multi_reduction <maximumf>, %57, %cst_27 [1] : vector<8x128xf32> to vector<8xf32>
    %59 = vector.shape_cast %58 : vector<8xf32> to vector<8x1xf32>
    %60 = vector.broadcast %59 : vector<8x1xf32> to vector<8x128xf32>
    %61 = arith.subf %57, %60 : vector<8x128xf32>
    %62 = math.exp %61 : vector<8x128xf32>
    %cst_28 = arith.constant dense<0.000000e+00> : vector<8xf32>
    %63 = vector.multi_reduction <add>, %62, %cst_28 [1] : vector<8x128xf32> to vector<8xf32>
    %64 = vector.shape_cast %63 : vector<8xf32> to vector<8x1xf32>
    %65 = math.log %64 : vector<8x1xf32>
    %66 = vector.broadcast %65 : vector<8x1xf32> to vector<8x128xf32>
    %67 = arith.subf %61, %66 : vector<8x128xf32>
    %c0_29 = arith.constant 0 : index
    %c0_30 = arith.constant 0 : index
    %c0_31 = arith.constant 0 : index
    %68 = vector.load %arg10[%c0_29, %c0_30, %c0_31] : memref<1x8x128xf32, #tpu.memory_space<vmem>>, vector<1x8x128xf32>
    %69 = vector.shape_cast %68 : vector<1x8x128xf32> to vector<8x128xf32>
    %70 = vector.shape_cast %67 : vector<8x128xf32> to vector<1x8x128xf32>
    tpu.vector_store %arg10[%c0_29, %c0_30, %c0_31], %70 {strides = array<i32>} : memref<1x8x128xf32, #tpu.memory_space<vmem>>, vector<1x8x128xf32>,
    %71 = vector.broadcast %59 : vector<8x1xf32> to vector<8x128xf32>
    %72 = arith.cmpf oeq, %57, %71 : vector<8x128xf32>
    %c128_i32 = arith.constant 128 : i32
    %73 = vector.broadcast %c128_i32 : i32 to vector<8x128xi32>
    %74 = arith.select %72, %53, %73 : vector<8x128xi1>, vector<8x128xi32>
    %cst_32 = arith.constant dense<2147483647> : vector<8xi32>
    %75 = vector.multi_reduction <minsi>, %74, %cst_32 [1] : vector<8x128xi32> to vector<8xi32>
    %76 = vector.shape_cast %75 : vector<8xi32> to vector<8x1xi32>
    %77 = vector.broadcast %76 : vector<8x1xi32> to vector<8x128xi32>
    %78 = arith.cmpi eq, %53, %77 : vector<8x128xi32>
    %79 = arith.extui %78 : vector<8x128xi1> to vector<8x128xi32>
    %80 = arith.sitofp %79 : vector<8x128xi32> to vector<8x128xf32>
    %c0_33 = arith.constant 0 : index
    %c0_34 = arith.constant 0 : index
    %81 = vector.load %arg12[%c0_33, %c0_34] : memref<8x128xf32, #tpu.memory_space<vmem>>, vector<8x128xf32>
    tpu.vector_store %arg12[%c0_33, %c0_34], %80 {strides = array<i32>} : memref<8x128xf32, #tpu.memory_space<vmem>>, vector<8x128xf32>,
    return
  }
  func.func @transform_0(%arg0: i32) -> (i32, i32) {
    %c0_i32 = arith.constant 0 : i32
    %c0_i32_0 = arith.constant 0 : i32
    %c0_i32_1 = arith.constant 0 : i32
    return %c0_i32, %c0_i32_0 : i32, i32
  }
  func.func @transform_1(%arg0: i32) -> (i32, i32) {
    %c0_i32 = arith.constant 0 : i32
    %c0_i32_0 = arith.constant 0 : i32
    %c0_i32_1 = arith.constant 0 : i32
    return %c0_i32, %c0_i32_0 : i32, i32
  }
  func.func @transform_2(%arg0: i32) -> (i32, i32) {
    %c0_i32 = arith.constant 0 : i32
    %c0_i32_0 = arith.constant 0 : i32
    %c0_i32_1 = arith.constant 0 : i32
    return %c0_i32, %c0_i32_0 : i32, i32
  }
  func.func @transform_3(%arg0: i32) -> (i32, i32) {
    %c0_i32 = arith.constant 0 : i32
    %c0_i32_0 = arith.constant 0 : i32
    %c0_i32_1 = arith.constant 0 : i32
    return %c0_i32, %c0_i32_0 : i32, i32
  }
  func.func @transform_4(%arg0: i32) -> (i32, i32) {
    %c0_i32 = arith.constant 0 : i32
    %c0_i32_0 = arith.constant 0 : i32
    %c0_i32_1 = arith.constant 0 : i32
    return %c0_i32, %c0_i32_0 : i32, i32
  }
  func.func @transform_5(%arg0: i32) -> (i32, i32) {
    %c0_i32 = arith.constant 0 : i32
    %c0_i32_0 = arith.constant 0 : i32
    %c0_i32_1 = arith.constant 0 : i32
    return %c0_i32, %c0_i32_0 : i32, i32
  }
  func.func @transform_6(%arg0: i32) -> (i32, i32) {
    %c0_i32 = arith.constant 0 : i32
    %c0_i32_0 = arith.constant 0 : i32
    %c0_i32_1 = arith.constant 0 : i32
    return %c0_i32, %c0_i32_0 : i32, i32
  }
  func.func @transform_7(%arg0: i32) -> (i32, i32) {
    %c0_i32 = arith.constant 0 : i32
    %c0_i32_0 = arith.constant 0 : i32
    %c0_i32_1 = arith.constant 0 : i32
    return %c0_i32, %c0_i32_0 : i32, i32
  }
  func.func @transform_8(%arg0: i32) -> (i32, i32) {
    %c0_i32 = arith.constant 0 : i32
    %c0_i32_0 = arith.constant 0 : i32
    %c0_i32_1 = arith.constant 0 : i32
    return %c0_i32, %c0_i32_0 : i32, i32
  }
  func.func @transform_9(%arg0: i32) -> (i32, i32, i32) {
    %c0_i32 = arith.constant 0 : i32
    %c0_i32_0 = arith.constant 0 : i32
    %c0_i32_1 = arith.constant 0 : i32
    return %arg0, %c0_i32, %c0_i32_0 : i32, i32, i32
  }
}

</mosaic_0001>

<bundles_post_ra>
// kernel: seq2seq_forward.2
= control target key start
LH: loop header
LB: loop body
LE: loop exit
PB: predicated region body
PF: predicated region fallthrough
CT: control target
= control target key end

     0   :  { %10 = vsyncpa [#allocation3], 0  ;;  %s1111_s18 = smov 0   ;;  %s1284_s0 = inlined_call_operand.vmem [shape: bf16[8,8,128], index: 0, kind: input, shape index: {}]   ;;  %s1285_s1 = inlined_call_operand.vmem [shape: bf16[128,384], index: 1, kind: input, shape index: {}]   ;;  %s1286_s2 = inlined_call_operand.hbm [shape: bf16[128,384], index: 2, kind: input, shape index: {}]   ;;  %s1287_s3 = inlined_call_operand.vmem [shape: f32[1,384], index: 3, kind: input, shape index: {}]   ;;  %s1288_s4 = inlined_call_operand.vmem [shape: f32[1,384], index: 4, kind: input, shape index: {}]   ;;  %s1289_s5 = inlined_call_operand.vmem [shape: f32[8,128], index: 5, kind: output, shape index: {}]  }
   0x1 LB: > { %s1117_s19 = sadd.s32 4294967295, %s1072_s18   ;;  %p810_p0 = scmp.ge.s32.totalorder %s1072_s18, 1  ;;  %s1072_s18 = sphi %s1111_s18, %s16_s18  }
   0x2   : > { %p152_p1 = scmp.lt.s32.totalorder %s1072_s18, 9  ;;  %s1074_s20 = smov [#allocation2]  }
   0x3   : > { %s167_s21 = sshll.u32 %s1074_s20, 4  ;;  %p1290_p4 = scmp.eq.s32.totalorder %s1117_s19, 0  ;;  %s168_s21 = int_to_ptr.vmem [resolvable:$true] %s167_s21 }
   0x4   : > { %p1122_p3 = pnand %p810_p0, %p152_p1  ;;  %s1034_s26 = scalar_lea.hbm %s1286_s2, 3072 }
   0x5   : > { %p1035_p7 = scmp.ne.s32.totalorder %s1286_s2, %s1034_s26  ;;  %p1041_p11 = scmp.lt.u32.totalorder %s1034_s26, %s1286_s2 }
   0x6   : > { %s1292_s22 = scalar_select %p1122_p3, 1, 0 }
   0x7   : > { %p939_p5 = pneg %p1122_p3 }
   0x9   : > { %p1131_p6 = pnand %p1290_p4, %p939_p5 }
   0xb   : > { %p1036_p8 = pneg %p1131_p6 }
   0xd   : > { %p1037_p9 = pnand %p1036_p8, %p1035_p7 }
   0xf   : > { %p1038_p10 = pneg %p1037_p9 }
  0x11   : > { %p1043_p12 = pnand %p1041_p11, %p1038_p10 }
  0x13   : > { %1046 = shalt.err (!%p1043_p12)
}
  0x14   : > { %s1047_s6 = scalar_lea.vmem %s168_s21, 3072  ;;  %p1055_p5 = scmp.lt.s32.totalorder %s168_s21, %s168_s21 }
  0x15   : > { %p1048_p13 = scmp.ne.s32.totalorder %s168_s21, %s1047_s6  ;;  %p1056_p2 = scmp.lt.s32.totalorder %s1047_s6, %s1047_s6 }
  0x17   : > { %p1050_p0 = pnand %p1048_p13, %p1036_p8  ;;  %p1057_p4 = por %p1056_p2, %p1055_p5 }
  0x19   : > { %p1051_p1 = pneg %p1050_p0 }
  0x1b   : > { %p1058_p3 = pnand %p1057_p4, %p1051_p1 }
  0x1d   : > { %1061 = shalt.err (!%p1058_p3)
}
  0x1e   : > { %s1075_s7 = smov 192   ;;  %s1076_s8 = smov 12  }
  0x1f   : > { %942 = dma.hbm_to_vmem [thread:$0]  (!%p1131_p6), %s1286_s2, 3072, %s168_s21, [#allocation3], %s1075_s7, %s1075_s7, %s1076_s8  }
  0x20   : > { %p1294_p7 = scmp.ne.s32.totalorder %s1292_s22, 0 }
  0x21   : > { %p1295_p9 = scmp.eq.s32.totalorder (!%p1294_p7), %s1117_s19, 0 }
  0x22   : > { %196 = sbr.rel (%p1294_p7) target bundleno = 378 (0x17a), region = 40 }
  0x29   : > { %1067 = dma.done.wait (%p1295_p9), [#allocation3], 3072   ;;  %p1296_p8 = pmov %p1295_p9 }
  0x2a   : > { %p218_p2 = scmp.lt.s32.totalorder %s1117_s19, 7  ;;  %p1297_p3 = scmp.ne.s32.totalorder %s1117_s19, 0 }
  0x2b   : > { %1069 = vsyncadd (%p1296_p8), [#allocation3], 4294964224  ;;  %v1077_v0 = vmov (!%p1297_p3), 0.0  }
  0x2c   : > { %s219_s11 = scalar_select %p218_p2, %s1117_s19, 7 }
  0x2d   : > { %226 = sbr.rel (%p1297_p3) target bundleno = 52 (0x34), region = 48  ;;  %227 = vst [vmem:[%s1289_s5] sm:$0xff] (!%p1297_p3), %v1077_v0 }
  0x2e   : > { %s815_s12 = sshll.u32 %s219_s11, 2 }
  0x2f   : > { %s1162_s15 = scalar_lea.vmem %s1284_s0, %s815_s12 }
  0x34 PF: > { %v960_v1 = vld [vmem:[%s1285_s1 + $0x4] ss:$12 sps:$4 sm:$0xff]   ;;  %v962_v2 = vld [vmem:[%s1285_s1] ss:$12 sps:$4 sm:$0xff]   ;;  %v1078_v3 = vmov 0.0   ;;  %v1079_v4 = vmov 0   ;;  %v264_v58 = vlaneseq }
  0x35   : > { %887 = vmatprep.subr.bf16.mxu1 %v1078_v3  ;;  %439 = vmatprep.mubr.bf16.mxu0 %v1079_v4  ;;  %v963_v5 = vld [vmem:[%s1285_s1 + $0x1c] ss:$12 sps:$4 sm:$0xff]   ;;  %vm1080_vm0 = vmmov 0   ;;  %v965_v6 = vld [vmem:[%s1285_s1 + $0x18] ss:$12 sps:$4 sm:$0xff]  }
  0x36   : > { %407 = vmatprep.subr.bf16.mxu0 %v960_v1  ;;  %903 = vmatprep.mubr.msk.bf16.mxu1 %vm1080_vm0, %v1078_v3  ;;  %v966_v7 = vld [vmem:[%s1285_s1 + $0x34] ss:$12 sps:$4 sm:$0xff]   ;;  %v968_v8 = vld [vmem:[%s1285_s1 + $0x30] ss:$12 sps:$4 sm:$0xff]   ;;  %v969_v9 = vld [vmem:[%s1285_s1 + $0x4c] ss:$12 sps:$4 sm:$0xff]  }
  0x37   : > { %408 = vmatpush1.bf16.msra.mxu0 %v962_v2  ;;  %v980_v10 = vld [vmem:[%s1285_s1 + $0x8] ss:$12 sps:$4 sm:$0xff]   ;;  %v972_v12 = vld [vmem:[%s1285_s1 + $0x64] ss:$12 sps:$4 sm:$0xff]   ;;  %v984_v13 = vld [vmem:[%s1285_s1 + $0x20] ss:$12 sps:$4 sm:$0xff]  }
  0x38   : > { %409 = vmatprep.subr.bf16.mxu0 %v963_v5  ;;  %v971_v11 = vld [vmem:[%s1285_s1 + $0x48] ss:$12 sps:$4 sm:$0xff]   ;;  %888 = vmatpush3.bf16.msra.mxu1 %v980_v10  ;;  %v974_v14 = vld [vmem:[%s1285_s1 + $0x60] ss:$12 sps:$4 sm:$0xff]   ;;  %v986_v15 = vld [vmem:[%s1285_s1 + $0x38] ss:$12 sps:$4 sm:$0xff]  }
  0x39   : > { %889 = vmatprep.subr.bf16.mxu1 %v1078_v3  ;;  %v975_v16 = vld [vmem:[%s1285_s1 + $0x7c] ss:$12 sps:$4 sm:$0xff]   ;;  %v977_v17 = vld [vmem:[%s1285_s1 + $0x78] ss:$12 sps:$4 sm:$0xff]   ;;  %v978_v19 = vld [vmem:[%s1285_s1 + $0x94] ss:$12 sps:$4 sm:$0xff]  }
  0x3a   : > { %v990_v18 = vld [vmem:[%s1285_s1 + $0x50] ss:$12 sps:$4 sm:$0xff]   ;;  %v994_v21 = vld [vmem:[%s1285_s1 + $0x68] ss:$12 sps:$4 sm:$0xff]   ;;  %v982_v22 = vld [vmem:[%s1285_s1 + $0xac] ss:$12 sps:$4 sm:$0xff]  }
  0x3b   : > { %410 = vmatpush1.bf16.msra.mxu0 %v965_v6  ;;  %v981_v20 = vld [vmem:[%s1285_s1 + $0x90] ss:$12 sps:$4 sm:$0xff]   ;;  %v985_v23 = vld [vmem:[%s1285_s1 + $0xa8] ss:$12 sps:$4 sm:$0xff]   ;;  %v998_v24 = vld [vmem:[%s1285_s1 + $0x80] ss:$12 sps:$4 sm:$0xff]  }
  0x3c   : > { %411 = vmatprep.subr.bf16.mxu0 %v966_v7  ;;  %890 = vmatpush3.bf16.msra.mxu1 %v984_v13  ;;  %v989_v25 = vld [vmem:[#allocation2 + $0x4] ss:$12 sps:$4 sm:$0xff]   ;;  %v987_v26 = vld [vmem:[#allocation2] ss:$12 sps:$4 sm:$0xff]   ;;  %v993_v29 = vld [vmem:[#allocation2 + $0x1c] ss:$12 sps:$4 sm:$0xff]  }
  0x3d   : > { %891 = vmatprep.subr.bf16.mxu1 %v1078_v3  ;;  %v228_v27 = vld [vmem:[%s1162_s15] sm:$0xf]  ;;  %v1002_v28 = vld [vmem:[%s1285_s1 + $0x98] ss:$12 sps:$4 sm:$0xff]   ;;  %v1006_v31 = vld [vmem:[%s1285_s1 + $0xb0] ss:$12 sps:$4 sm:$0xff]  }
  0x3e   : > { %v991_v30 = vld [vmem:[#allocation2 + $0x18] ss:$12 sps:$4 sm:$0xff]   ;;  %v997_v32 = vld [vmem:[#allocation2 + $0x34] ss:$12 sps:$4 sm:$0xff]   ;;  %v995_v33 = vld [vmem:[#allocation2 + $0x30] ss:$12 sps:$4 sm:$0xff]  }
  0x3f   : > { %412 = vmatpush1.bf16.msra.mxu0 %v968_v8  ;;  %v1013_v34 = vld [vmem:[#allocation2 + $0x8] ss:$12 sps:$4 sm:$0xff]   ;;  %v1001_v35 = vld [vmem:[#allocation2 + $0x4c] ss:$12 sps:$4 sm:$0xff]   ;;  %v1005_v38 = vld [vmem:[#allocation2 + $0x64] ss:$12 sps:$4 sm:$0xff]  }
  0x40   : > { %413 = vmatprep.subr.bf16.mxu0 %v969_v9  ;;  %892 = vmatpush3.bf16.msra.mxu1 %v986_v15  ;;  %v999_v36 = vld [vmem:[#allocation2 + $0x48] ss:$12 sps:$4 sm:$0xff]   ;;  %v1017_v37 = vld [vmem:[#allocation2 + $0x20] ss:$12 sps:$4 sm:$0xff]   ;;  %v1018_v40 = vld [vmem:[#allocation2 + $0x38] ss:$12 sps:$4 sm:$0xff]  }
  0x41   : > { %893 = vmatprep.subr.bf16.mxu1 %v1078_v3  ;;  %v1003_v39 = vld [vmem:[#allocation2 + $0x60] ss:$12 sps:$4 sm:$0xff]   ;;  %v1009_v41 = vld [vmem:[#allocation2 + $0x7c] ss:$12 sps:$4 sm:$0xff]   ;;  %v1007_v42 = vld [vmem:[#allocation2 + $0x78] ss:$12 sps:$4 sm:$0xff]  }
  0x42   : > { %v1019_v43 = vld [vmem:[#allocation2 + $0x50] ss:$12 sps:$4 sm:$0xff]   ;;  %v1012_v44 = vld [vmem:[#allocation2 + $0x94] ss:$12 sps:$4 sm:$0xff]   ;;  %v1016_v47 = vld [vmem:[#allocation2 + $0xac] ss:$12 sps:$4 sm:$0xff]  }
  0x43   : > { %414 = vmatpush1.bf16.msra.mxu0 %v971_v11  ;;  %v1010_v45 = vld [vmem:[#allocation2 + $0x90] ss:$12 sps:$4 sm:$0xff]   ;;  %v1020_v46 = vld [vmem:[#allocation2 + $0x68] ss:$12 sps:$4 sm:$0xff]   ;;  %v1264_v49 = vld [vmem:[%s1289_s5] sm:$0xff]  ;;  %v265_v59 = vshrl.u32 %v264_v58, 7 }
  0x44   : > { %415 = vmatprep.subr.bf16.mxu0 %v972_v12  ;;  %894 = vmatpush3.bf16.msra.mxu1 %v990_v18  ;;  %v1014_v48 = vld [vmem:[#allocation2 + $0xa8] ss:$12 sps:$4 sm:$0xff]   ;;  %v1021_v50 = vld [vmem:[#allocation2 + $0x80] ss:$12 sps:$4 sm:$0xff]   ;;  %v488_v51 = vpack.c.bf16 %v1264_v49, %v1264_v49  ;;  %v1022_v52 = vld [vmem:[#allocation2 + $0x98] ss:$12 sps:$4 sm:$0xff]  }
  0x45   : > { %895 = vmatprep.subr.bf16.mxu1 %v1078_v3  ;;  %v1023_v53 = vld [vmem:[#allocation2 + $0xb0] ss:$12 sps:$4 sm:$0xff]   ;;  %v266_v60 = vsub.s32 0, %v265_v59  ;;  %v521_v61 = vld [vmem:[%s1288_s4] sm:$0x7]  ;;  %v270_v63 = vsub.s32 1, %v265_v59 }
  0x46   : > { %v262_v62 = vld [vmem:[%s1287_s3] sm:$0x7] }
  0x47   : > { %416 = vmatpush1.bf16.msra.mxu0 %v974_v14  ;;  %v267_v0 = vrot.slane %v262_v62, %v266_v60  ;;  %v526_v1 = vrot.slane %v521_v61, %v266_v60  ;;  %v271_v2 = vrot.slane %v262_v62, %v270_v63 }
  0x48   : > { %417 = vmatprep.subr.bf16.mxu0 %v975_v16  ;;  %896 = vmatpush3.bf16.msra.mxu1 %v994_v21 }
  0x49   : > { %897 = vmatprep.subr.bf16.mxu1 %v1078_v3 }
  0x4b   : > { %418 = vmatpush1.bf16.msra.mxu0 %v977_v17 }
  0x4c   : > { %419 = vmatprep.subr.bf16.mxu0 %v978_v19  ;;  %898 = vmatpush3.bf16.msra.mxu1 %v998_v24 }
  0x4d   : > { %899 = vmatprep.subr.bf16.mxu1 %v1078_v3 }
  0x4f   : > { %420 = vmatpush1.bf16.msra.mxu0 %v981_v20  ;;  %v274_v20 = vsub.s32 2, %v265_v59 }
  0x50   : > { %421 = vmatprep.subr.bf16.mxu0 %v982_v22  ;;  %900 = vmatpush3.bf16.msra.mxu1 %v1002_v28 }
  0x51   : > { %901 = vmatprep.subr.bf16.mxu1 %v1078_v3  ;;  %v534_v21 = vrot.slane %v521_v61, %v274_v20 }
  0x53   : > { %422 = vmatpush1.bf16.msra.mxu0 %v985_v23  ;;  %v275_v23 = vrot.slane %v262_v62, %v274_v20 }
  0x54   : > { %666 = vmatprep.subr.bf16.mxu0 %v989_v25  ;;  %902 = vmatpush3.bf16.msra.mxu1 %v1006_v31 }
  0x55   : > { %907 = vmatprep.subr.bf16.mxu1 %v1078_v3 }
  0x56   : > { %440 = vmatmul.mubr.bf16.vlgmr.msra.gmra.mrb[0].mxu0 %v228_v27 }
  0x57   : > { %667 = vmatpush1.bf16.msra.mxu0 %v987_v26  ;;  %698 = vmatprep.mubr.bf16.mxu0 %v1079_v4  ;;  %v927_v4 = vadd.f32 %v526_v1, %v267_v0 }
  0x58   : > { %668 = vmatprep.subr.bf16.mxu0 %v993_v29  ;;  %904 = vmatmul.mubr.bf16.vlgmr.msra.gmra.mrb[0].mxu1 %v228_v27 }
  0x59   : > { %908 = vmatpush3.bf16.msra.mxu1 %v1013_v34  ;;  %923 = vmatprep.mubr.msk.bf16.mxu1 %vm1080_vm0, %v1078_v3 }
  0x5a   : > { %909 = vmatprep.subr.bf16.mxu1 %v1078_v3 }
  0x5b   : > { %669 = vmatpush1.bf16.msra.mxu0 %v991_v30 }
  0x5c   : > { %670 = vmatprep.subr.bf16.mxu0 %v997_v32 }
  0x5d   : > { %910 = vmatpush3.bf16.msra.mxu1 %v1017_v37 }
  0x5e   : > { %911 = vmatprep.subr.bf16.mxu1 %v1078_v3 }
  0x5f   : > { %671 = vmatpush1.bf16.msra.mxu0 %v995_v33 }
  0x60   : > { %672 = vmatprep.subr.bf16.mxu0 %v1001_v35 }
  0x61   : > { %912 = vmatpush3.bf16.msra.mxu1 %v1018_v40 }
  0x62   : > { %913 = vmatprep.subr.bf16.mxu1 %v1078_v3 }
  0x63   : > { %673 = vmatpush1.bf16.msra.mxu0 %v999_v36 }
  0x64   : > { %674 = vmatprep.subr.bf16.mxu0 %v1005_v38 }
  0x65   : > { %914 = vmatpush3.bf16.msra.mxu1 %v1019_v43 }
  0x66   : > { %915 = vmatprep.subr.bf16.mxu1 %v1078_v3 }
  0x67   : > { %675 = vmatpush1.bf16.msra.mxu0 %v1003_v39 }
  0x68   : > { %676 = vmatprep.subr.bf16.mxu0 %v1009_v41 }
  0x69   : > { %916 = vmatpush3.bf16.msra.mxu1 %v1020_v46 }
  0x6a   : > { %917 = vmatprep.subr.bf16.mxu1 %v1078_v3 }
  0x6b   : > { %677 = vmatpush1.bf16.msra.mxu0 %v1007_v42 }
  0x6c   : > { %678 = vmatprep.subr.bf16.mxu0 %v1012_v44 }
  0x6d   : > { %918 = vmatpush3.bf16.msra.mxu1 %v1021_v50 }
  0x6e   : > { %919 = vmatprep.subr.bf16.mxu1 %v1078_v3 }
  0x6f   : > { %679 = vmatpush1.bf16.msra.mxu0 %v1010_v45 }
  0x70   : > { %680 = vmatprep.subr.bf16.mxu0 %v1016_v47 }
  0x71   : > { %920 = vmatpush3.bf16.msra.mxu1 %v1022_v52 }
  0x72   : > { %921 = vmatprep.subr.bf16.mxu1 %v1078_v3  ;;  %v530_v3 = vrot.slane %v521_v61, %v270_v63 }
  0x73   : > { %681 = vmatpush1.bf16.msra.mxu0 %v1014_v48 }
  0x74   : > { %v929_v6 = vadd.f32 %v530_v3, %v271_v2 }
  0x75   : > { %922 = vmatpush3.bf16.msra.mxu1 %v1023_v53 }
  0x76   : > { %699 = vmatmul.mubr.bf16.vlgmr.msra.gmra.mrb[0].mxu0 %v488_v51 }
  0x78   : > { %924 = vmatmul.mubr.bf16.vlgmr.msra.gmra.mrb[4].mxu1 %v488_v51 }
 0x12b   : > { %v482_v54 = vpop.f32.mrb[0].mxu1 }
 0x12c   : > { %v905_v55 = vpop.f32.mrb[1].mxu1  ;;  %v483_v27 = vadd.f32 %v482_v54, %v275_v23 }
 0x12d   : > { %v485_v56 = vpop.f32.mrb[2].mxu1 }
 0x12e   : > { %v906_v57 = vpop.f32.mrb[3].mxu1 }
 0x149   : > { %v700_v5 = vpop.f32.mrb[0].mxu0 }
 0x14a   : > { %v928_v7 = vadd.f32 %v927_v4, %v700_v5  ;;  %v702_v8 = vpop.f32.mrb[1].mxu0 }
 0x14b   : > { %v704_v9 = vpop.f32.mrb[2].mxu0  ;;  %v930_v12 = vadd.f32 %v929_v6, %v702_v8  ;;  %v741_v14 = vpop.f32.mrb[4].mxu1 }
 0x14c   : > { %v865_v10 = vmul.f32 -1.442695, %v928_v7  ;;  %v705_v11 = vpop.f32.mrb[3].mxu0  ;;  %v925_v15 = vpop.f32.mrb[5].mxu1  ;;  %v742_v25 = vadd.f32 %v741_v14, %v534_v21 }
 0x14d   : > { %v866_v13 = vmul.f32 -1.442695, %v930_v12  ;;  %v744_v16 = vpop.f32.mrb[6].mxu1 }
 0x14e   : > { %1024 = vpow2.f32 %v865_v10  ;;  %v926_v17 = vpop.f32.mrb[7].mxu1 }
 0x14f   : > { %1026 = vpow2.f32 %v866_v13 }
 0x158   : > { %v1025_v18 = vpop.eup %1024 }
 0x159   : > { %v751_v19 = vadd.f32 1.0, %v1025_v18  ;;  %v1027_v22 = vpop.eup %1026 }
 0x15a   : > { %v758_v24 = vadd.f32 1.0, %v1027_v22 }
 0x15b   : > { %1028 = vrcp.f32 %v751_v19 }
 0x15c   : > { %1030 = vrcp.f32 %v758_v24 }
 0x165   : > { %v1029_v26 = vpop.eup %1028 }
 0x166   : > { %v761_v28 = vmul.f32 %v1029_v26, %v742_v25  ;;  %v1031_v30 = vpop.eup %1030 }
 0x167   : > { %v764_v31 = vsub.f32 1.0, %v1031_v30  ;;  %v766_v33 = vmul.f32 %v1031_v30, %v1264_v49 }
 0x168   : > { %v762_v29 = vadd.f32 %v761_v28, %v483_v27 }
 0x16a   : > { %1032 = vtanh.f32 %v762_v29 }
 0x174   : > { %v1033_v32 = vpop.eup %1032 }
 0x175   : > { %v765_v34 = vmul.f32 %v1033_v32, %v764_v31 }
 0x177   : > { %v767_v35 = vadd.f32 %v766_v33, %v765_v34 }
 0x179   : > { %768 = vst [vmem:[%s1289_s5] sm:$0xff] %v767_v35 }
 0x17a PF: > { %s16_s18 = sadd.s32 1, %s1072_s18  }
 0x17b   : > { %p13_p4 = scmp.ge.s32.totalorder %s16_s18, 10  }
 0x17d   :  { %15 = sbr.rel (!%p13_p4) target bundleno = 1 (0x1), region = 75 }
 0x184   :  { %780 = vsyncpa [#allocation3], 1 }
 0x185   :  { %782 = vsyncpa [#allocation3 + $0x1], 1 }

// kernel: seq2seq_forward.3
= control target key start
LH: loop header
LB: loop body
LE: loop exit
PB: predicated region body
PF: predicated region fallthrough
CT: control target
= control target key end

     0   :  { %14 = vsyncpa [#allocation5], 0  ;;  %s2081_s0 = inlined_call_operand.vmem [shape: f32[8,128], index: 0, kind: input, shape index: {}]   ;;  %s2082_s1 = inlined_call_operand.vmem [shape: f32[8,128], index: 1, kind: input, shape index: {}]   ;;  %s2083_s2 = inlined_call_operand.vmem [shape: bf16[128,128], index: 2, kind: input, shape index: {}]   ;;  %s2084_s3 = inlined_call_operand.vmem [shape: bf16[128,384], index: 3, kind: input, shape index: {}]   ;;  %s2085_s4 = inlined_call_operand.vmem [shape: bf16[128,384], index: 4, kind: input, shape index: {}]   ;;  %s2086_s5 = inlined_call_operand.vmem [shape: f32[1,384], index: 5, kind: input, shape index: {}]   ;;  %s2087_s6 = inlined_call_operand.hbm [shape: f32[1,384], index: 6, kind: input, shape index: {}]   ;;  %s2088_s7 = inlined_call_operand.hbm [shape: bf16[128,128], index: 7, kind: input, shape index: {}]   ;;  %s2089_s8 = inlined_call_operand.hbm [shape: f32[1,128], index: 8, kind: input, shape index: {}]   ;;  %s2090_s9 = inlined_call_operand.vmem [shape: f32[7,8,128], index: 9, kind: output, shape index: {}]  }
   0x1   :  { %15 = vsyncpa [#allocation7], 0  ;;  %s1728_s30 = smov 0  }
   0x2 LB: > { %s1670_s10 = smov [#allocation6]   ;;  %s1734_s12 = sadd.s32 4294967295, %s1668_s30   ;;  %s1668_s30 = sphi %s1728_s30, %s21_s30  }
   0x3   : > { %s282_s11 = sshll.u32 %s1670_s10, 4  ;;  %p1228_p0 = scmp.ge.s32.totalorder %s1668_s30, 1  ;;  %s1744_s11 = int_to_ptr.vmem [resolvable:$true] %s282_s11 }
   0x4   : > { %p241_p1 = scmp.lt.s32.totalorder %s1668_s30, 8  ;;  %p1454_p3 = scmp.eq.s32.totalorder %s1734_s12, 0 }
   0x5   : > { %s1671_s14 = smov [#allocation4]   ;;  %s1672_s17 = smov [#allocation8]  }
   0x6   : > { %p1740_p4 = pnand %p1228_p0, %p241_p1  ;;  %s272_s15 = sshll.u32 %s1671_s14, 4  ;;  %s1754_s15 = int_to_ptr.vmem [resolvable:$true] %s272_s15 }
   0x7   : > { %s296_s18 = sshll.u32 %s1672_s17, 4  ;;  %s1570_s21 = scalar_lea.hbm %s2088_s7, 1024  ;;  %s1756_s18 = int_to_ptr.vmem [resolvable:$true] %s296_s18 }
   0x8   : > { %p1444_p5 = pneg %p1740_p4  ;;  %p1571_p7 = scmp.ne.s32.totalorder %s2088_s7, %s1570_s21 }
   0x9   : > { %p1577_p11 = scmp.lt.u32.totalorder %s1570_s21, %s2088_s7 }
   0xa   : > { %p1750_p6 = pnand %p1454_p3, %p1444_p5 }
   0xc   : > { %p1766_p8 = pneg %p1750_p6 }
   0xe   : > { %p1573_p9 = pnand %p1766_p8, %p1571_p7 }
  0x10   : > { %p1574_p10 = pneg %p1573_p9 }
  0x12   : > { %p1579_p12 = pnand %p1577_p11, %p1574_p10 }
  0x14   : > { %1582 = shalt.err (!%p1579_p12)
}
  0x15   : > { %s1583_s27 = scalar_lea.vmem %s1744_s11, 1024  ;;  %p1591_p5 = scmp.lt.s32.totalorder %s1744_s11, %s1744_s11 }
  0x16   : > { %p1584_p13 = scmp.ne.s32.totalorder %s1744_s11, %s1583_s27  ;;  %p1592_p2 = scmp.lt.s32.totalorder %s1583_s27, %s1583_s27 }
  0x18   : > { %p1586_p0 = pnand %p1584_p13, %p1766_p8  ;;  %p1593_p7 = por %p1592_p2, %p1591_p5 }
  0x1a   : > { %p1587_p1 = pneg %p1586_p0 }
  0x1c   : > { %p1594_p9 = pnand %p1593_p7, %p1587_p1 }
  0x1e   : > { %1597 = shalt.err (!%p1594_p9)
}
  0x1f   : > { %s1673_s28 = smov 64   ;;  %s1674_s29 = smov 4  }
  0x20   : > { %1450 = dma.hbm_to_vmem [thread:$0]  (!%p1750_p6), %s2088_s7, 1024, %s1744_s11, [#allocation7], %s1673_s28, %s1673_s28, %s1674_s29  }
  0x21   : > { %s1598_s20 = scalar_lea.hbm %s2087_s6, 48 }
  0x22   : > { %p1599_p2 = scmp.ne.s32.totalorder %s2087_s6, %s1598_s20  ;;  %p1605_p12 = scmp.lt.u32.totalorder %s1598_s20, %s2087_s6 }
  0x24   : > { %p1601_p10 = pnand %p1599_p2, %p1766_p8 }
  0x26   : > { %p1602_p11 = pneg %p1601_p10 }
  0x28   : > { %p1607_p13 = pnand %p1605_p12, %p1602_p11 }
  0x2a   : > { %1610 = shalt.err (!%p1607_p13)
}
  0x2b   : > { %s1611_s11 = scalar_lea.vmem %s1754_s15, 48  ;;  %s1618_s26 = scalar_lea.vmem %s1754_s15, 64 }
  0x2c   : > { %p1612_p0 = scmp.ne.s32.totalorder %s1754_s15, %s1611_s11  ;;  %p1619_p7 = scmp.lt.s32.totalorder %s1754_s15, %s1754_s15 }
  0x2d   : > { %p1620_p9 = scmp.lt.s32.totalorder %s1618_s26, %s1611_s11 }
  0x2e   : > { %p1614_p1 = pnand %p1612_p0, %p1766_p8 }
  0x2f   : > { %p1621_p2 = por %p1620_p9, %p1619_p7 }
  0x30   : > { %p1615_p5 = pneg %p1614_p1 }
  0x32   : > { %p1622_p10 = pnand %p1621_p2, %p1615_p5 }
  0x34   : > { %1625 = shalt.err (!%p1622_p10)
}
  0x35   : > { %1447 = dma.hbm_to_vmem [thread:$0]  (!%p1750_p6), %s2087_s6, 48, %s1754_s15, [#allocation5]  }
  0x36   : > { %s1626_s14 = scalar_lea.hbm %s2089_s8, 16 }
  0x37   : > { %p1627_p11 = scmp.ne.s32.totalorder %s2089_s8, %s1626_s14  ;;  %p1633_p0 = scmp.lt.u32.totalorder %s1626_s14, %s2089_s8 }
  0x39   : > { %p1629_p12 = pnand %p1627_p11, %p1766_p8 }
  0x3b   : > { %p1630_p13 = pneg %p1629_p12 }
  0x3d   : > { %p1635_p1 = pnand %p1633_p0, %p1630_p13 }
  0x3f   : > { %1638 = shalt.err (!%p1635_p1)
}
  0x40   : > { %s1639_s15 = scalar_lea.vmem %s1756_s18, 16  ;;  %s1646_s22 = scalar_lea.vmem %s1756_s18, 32 }
  0x41   : > { %p1640_p5 = scmp.ne.s32.totalorder %s1756_s18, %s1639_s15  ;;  %p1647_p2 = scmp.lt.s32.totalorder %s1756_s18, %s1756_s18 }
  0x42   : > { %p1648_p10 = scmp.lt.s32.totalorder %s1646_s22, %s1639_s15 }
  0x43   : > { %p1642_p7 = pnand %p1640_p5, %p1766_p8 }
  0x44   : > { %p1649_p11 = por %p1648_p10, %p1647_p2 }
  0x45   : > { %p1643_p9 = pneg %p1642_p7 }
  0x47   : > { %p1650_p12 = pnand %p1649_p11, %p1643_p9 }
  0x49   : > { %1653 = shalt.err (!%p1650_p12)
}
  0x4a   : > { %1453 = dma.hbm_to_vmem [thread:$0]  (!%p1750_p6), %s2089_s8, 16, %s1756_s18, [#allocation7]  }
  0x4b   : > { %309 = sbr.rel (%p1740_p4) target bundleno = 1291 (0x50b), region = 56 }
  0x52   : > { %1659 = dma.done.wait (%p1454_p3), [#allocation5], 48  }
  0x53   : > { %1661 = vsyncadd (%p1454_p3), [#allocation5], 4294967248 }
  0x54   : > { %1663 = dma.done.wait (%p1454_p3), [#allocation7], 1040  }
  0x55   : > { %1665 = vsyncadd (%p1454_p3), [#allocation7], 4294966256  ;;  %p347_p8 = scmp.lt.s32.totalorder %s1734_s12, 6  ;;  %p2094_p4 = scmp.ne.s32.totalorder %s1734_s12, 0 }
  0x56   : > { %v356_v0 = vld [vmem:[%s2081_s0] sm:$0xff] (!%p2094_p4) }
  0x57   : > { %s348_s16 = scalar_select %p347_p8, %s1734_s12, 6 }
  0x58   : > { %355 = sbr.rel (%p2094_p4) target bundleno = 95 (0x5f), region = 72  ;;  %v358_v1 = vld [vmem:[%s2082_s1] sm:$0xff] (!%p2094_p4)  ;;  %357 = vst [vmem:[#allocation2] sm:$0xff] (!%p2094_p4), %v356_v0 }
  0x59   : > { %s1236_s18 = sshll.u32 %s348_s16, 3  ;;  %359 = vst [vmem:[#allocation3] sm:$0xff] (!%p2094_p4), %v358_v1 }
  0x5a   : > { %s1850_s11 = scalar_lea.vmem %s2090_s9, %s1236_s18 }
  0x5f PF: > { %v1476_v2 = vld [vmem:[%s2083_s2] sm:$0xff]   ;;  %v1675_v3 = vmov 0.0   ;;  %v1477_v4 = vld [vmem:[%s2083_s2 + $0x8] sm:$0xff]   ;;  %vm1676_vm0 = vmmov 0   ;;  %v1478_v5 = vld [vmem:[%s2083_s2 + $0x10] sm:$0xff]   ;;  %v1677_v38 = vmov 0  }
  0x60   : > { %1344 = vmatprep.subr.bf16.mxu0 %v1675_v3  ;;  %1360 = vmatprep.mubr.msk.bf16.mxu0 %vm1676_vm0, %v1675_v3  ;;  %v1484_v6 = vld [vmem:[%s2084_s3 + $0x4] ss:$12 sps:$4 sm:$0xff]   ;;  %v1486_v7 = vld [vmem:[%s2084_s3] ss:$12 sps:$4 sm:$0xff]   ;;  %v1479_v8 = vld [vmem:[%s2083_s2 + $0x18] sm:$0xff]  }
  0x61   : > { %1345 = vmatpush3.bf16.msra.mxu0 %v1476_v2  ;;  %645 = vmatprep.subr.bf16.mxu1 %v1484_v6  ;;  %v1488_v9 = vld [vmem:[%s2084_s3 + $0x1c] ss:$12 sps:$4 sm:$0xff]   ;;  %v1490_v10 = vld [vmem:[%s2084_s3 + $0x18] ss:$12 sps:$4 sm:$0xff]   ;;  %v1492_v11 = vld [vmem:[%s2084_s3 + $0x34] ss:$12 sps:$4 sm:$0xff]  }
  0x62   : > { %1346 = vmatprep.subr.bf16.mxu0 %v1675_v3  ;;  %646 = vmatpush1.bf16.msra.mxu1 %v1486_v7  ;;  %v1480_v12 = vld [vmem:[%s2083_s2 + $0x20] sm:$0xff]   ;;  %v1494_v13 = vld [vmem:[%s2084_s3 + $0x30] ss:$12 sps:$4 sm:$0xff]   ;;  %v1496_v14 = vld [vmem:[%s2084_s3 + $0x4c] ss:$12 sps:$4 sm:$0xff]  }
  0x63   : > { %647 = vmatprep.subr.bf16.mxu1 %v1488_v9  ;;  %v1481_v15 = vld [vmem:[%s2083_s2 + $0x28] sm:$0xff]   ;;  %v1500_v17 = vld [vmem:[%s2084_s3 + $0x64] ss:$12 sps:$4 sm:$0xff]   ;;  %v1483_v19 = vld [vmem:[%s2083_s2 + $0x38] sm:$0xff]   ;;  %677 = vmatprep.mubr.bf16.mxu1 %v1677_v38 }
  0x64   : > { %v1498_v16 = vld [vmem:[%s2084_s3 + $0x48] ss:$12 sps:$4 sm:$0xff]   ;;  %v1502_v20 = vld [vmem:[%s2084_s3 + $0x60] ss:$12 sps:$4 sm:$0xff]   ;;  %v1506_v23 = vld [vmem:[%s2084_s3 + $0x78] ss:$12 sps:$4 sm:$0xff]  }
  0x65   : > { %1347 = vmatpush3.bf16.msra.mxu0 %v1477_v4  ;;  %v1482_v18 = vld [vmem:[%s2083_s2 + $0x30] sm:$0xff]   ;;  %v360_v21 = vld [vmem:[#allocation3] sm:$0xff]  ;;  %v1495_v31 = vld [vmem:[%s2084_s3 + $0x38] ss:$12 sps:$4 sm:$0xff]  }
  0x66   : > { %1348 = vmatprep.subr.bf16.mxu0 %v1675_v3  ;;  %648 = vmatpush1.bf16.msra.mxu1 %v1490_v10  ;;  %v1504_v22 = vld [vmem:[%s2084_s3 + $0x7c] ss:$12 sps:$4 sm:$0xff]   ;;  %v1508_v24 = vld [vmem:[%s2084_s3 + $0x94] ss:$12 sps:$4 sm:$0xff]   ;;  %v361_v26 = vpack.c.bf16 %v360_v21, %v360_v21  ;;  %v1512_v28 = vld [vmem:[%s2084_s3 + $0xac] ss:$12 sps:$4 sm:$0xff]  }
  0x67   : > { %649 = vmatprep.subr.bf16.mxu1 %v1492_v11  ;;  %v1487_v25 = vld [vmem:[%s2084_s3 + $0x8] ss:$12 sps:$4 sm:$0xff]   ;;  %v1510_v27 = vld [vmem:[%s2084_s3 + $0x90] ss:$12 sps:$4 sm:$0xff]   ;;  %v1491_v29 = vld [vmem:[%s2084_s3 + $0x20] ss:$12 sps:$4 sm:$0xff]  }
  0x68   : > { %v1514_v30 = vld [vmem:[%s2084_s3 + $0xa8] ss:$12 sps:$4 sm:$0xff]   ;;  %v1499_v32 = vld [vmem:[%s2084_s3 + $0x50] ss:$12 sps:$4 sm:$0xff]   ;;  %v1507_v34 = vld [vmem:[%s2084_s3 + $0x80] ss:$12 sps:$4 sm:$0xff]  }
  0x69   : > { %1349 = vmatpush3.bf16.msra.mxu0 %v1478_v5  ;;  %v1503_v33 = vld [vmem:[%s2084_s3 + $0x68] ss:$12 sps:$4 sm:$0xff]   ;;  %v1511_v35 = vld [vmem:[%s2084_s3 + $0x98] ss:$12 sps:$4 sm:$0xff]   ;;  %v1515_v36 = vld [vmem:[%s2084_s3 + $0xb0] ss:$12 sps:$4 sm:$0xff]  }
  0x6a   : > { %1350 = vmatprep.subr.bf16.mxu0 %v1675_v3  ;;  %650 = vmatpush1.bf16.msra.mxu1 %v1494_v13  ;;  %v1518_v37 = vld [vmem:[%s2085_s4 + $0x4] ss:$12 sps:$4 sm:$0xff]   ;;  %v1516_v40 = vld [vmem:[%s2085_s4] ss:$12 sps:$4 sm:$0xff]   ;;  %v1537_v41 = vld [vmem:[%s2085_s4 + $0x8] ss:$12 sps:$4 sm:$0xff]  }
  0x6b   : > { %651 = vmatprep.subr.bf16.mxu1 %v1496_v14  ;;  %v1521_v44 = vld [vmem:[%s2085_s4 + $0x1c] ss:$12 sps:$4 sm:$0xff]   ;;  %v1519_v47 = vld [vmem:[%s2085_s4 + $0x18] ss:$12 sps:$4 sm:$0xff]   ;;  %v1541_v48 = vld [vmem:[%s2085_s4 + $0x20] ss:$12 sps:$4 sm:$0xff]  }
  0x6c   : > { %v1524_v49 = vld [vmem:[%s2085_s4 + $0x34] ss:$12 sps:$4 sm:$0xff]   ;;  %v1522_v50 = vld [vmem:[%s2085_s4 + $0x30] ss:$12 sps:$4 sm:$0xff]   ;;  %v1542_v51 = vld [vmem:[%s2085_s4 + $0x38] ss:$12 sps:$4 sm:$0xff]  }
  0x6d   : > { %1351 = vmatpush3.bf16.msra.mxu0 %v1479_v8  ;;  %v1527_v52 = vld [vmem:[%s2085_s4 + $0x4c] ss:$12 sps:$4 sm:$0xff]   ;;  %v1525_v53 = vld [vmem:[%s2085_s4 + $0x48] ss:$12 sps:$4 sm:$0xff]   ;;  %v1543_v54 = vld [vmem:[%s2085_s4 + $0x50] ss:$12 sps:$4 sm:$0xff]  }
  0x6e   : > { %1352 = vmatprep.subr.bf16.mxu0 %v1675_v3  ;;  %652 = vmatpush1.bf16.msra.mxu1 %v1498_v16  ;;  %v1530_v55 = vld [vmem:[%s2085_s4 + $0x64] ss:$12 sps:$4 sm:$0xff]   ;;  %v1528_v56 = vld [vmem:[%s2085_s4 + $0x60] ss:$12 sps:$4 sm:$0xff]   ;;  %v1544_v57 = vld [vmem:[%s2085_s4 + $0x68] ss:$12 sps:$4 sm:$0xff]  }
  0x6f   : > { %653 = vmatprep.subr.bf16.mxu1 %v1500_v17  ;;  %v1533_v58 = vld [vmem:[%s2085_s4 + $0x7c] ss:$12 sps:$4 sm:$0xff]   ;;  %v1531_v59 = vld [vmem:[%s2085_s4 + $0x78] ss:$12 sps:$4 sm:$0xff]   ;;  %v1545_v60 = vld [vmem:[%s2085_s4 + $0x80] ss:$12 sps:$4 sm:$0xff]  }
  0x70   : > { %v1536_v61 = vld [vmem:[%s2085_s4 + $0x94] ss:$12 sps:$4 sm:$0xff]   ;;  %v1534_v62 = vld [vmem:[%s2085_s4 + $0x90] ss:$12 sps:$4 sm:$0xff]   ;;  %v1546_v63 = vld [vmem:[%s2085_s4 + $0x98] ss:$12 sps:$4 sm:$0xff]  }
  0x71   : > { %1353 = vmatpush3.bf16.msra.mxu0 %v1480_v12  ;;  %v1540_v0 = vld [vmem:[%s2085_s4 + $0xac] ss:$12 sps:$4 sm:$0xff]   ;;  %v1538_v1 = vld [vmem:[%s2085_s4 + $0xa8] ss:$12 sps:$4 sm:$0xff]   ;;  %v2054_v2 = vld [vmem:[#allocation2] sm:$0xff] }
  0x72   : > { %1354 = vmatprep.subr.bf16.mxu0 %v1675_v3  ;;  %654 = vmatpush1.bf16.msra.mxu1 %v1502_v20  ;;  %v1547_v4 = vld [vmem:[%s2085_s4 + $0xb0] ss:$12 sps:$4 sm:$0xff]   ;;  %v726_v5 = vpack.c.bf16 %v2054_v2, %v2054_v2  ;;  %v1548_v6 = vld [vmem:[#allocation6] sm:$0xff]   ;;  %v1550_v8 = vld [vmem:[#allocation6 + $0x10] sm:$0xff]  }
  0x73   : > { %655 = vmatprep.subr.bf16.mxu1 %v1504_v22  ;;  %v1549_v7 = vld [vmem:[#allocation6 + $0x8] sm:$0xff]   ;;  %v1551_v9 = vld [vmem:[#allocation6 + $0x18] sm:$0xff]   ;;  %v1552_v10 = vld [vmem:[#allocation6 + $0x20] sm:$0xff]  }
  0x74   : > { %v1553_v11 = vld [vmem:[#allocation6 + $0x28] sm:$0xff]   ;;  %v1554_v12 = vld [vmem:[#allocation6 + $0x30] sm:$0xff]   ;;  %v1555_v13 = vld [vmem:[#allocation6 + $0x38] sm:$0xff]  }
  0x75   : > { %1355 = vmatpush3.bf16.msra.mxu0 %v1481_v15  ;;  %v759_v21 = vld [vmem:[#allocation4] sm:$0x7]  ;;  %v500_v22 = vld [vmem:[%s2086_s5] sm:$0x7] }
  0x76   : > { %1356 = vmatprep.subr.bf16.mxu0 %v1675_v3  ;;  %656 = vmatpush1.bf16.msra.mxu1 %v1506_v23 }
  0x77   : > { %657 = vmatprep.subr.bf16.mxu1 %v1508_v24 }
  0x79   : > { %1357 = vmatpush3.bf16.msra.mxu0 %v1482_v18  ;;  %v502_v18 = vlaneseq }
  0x7a   : > { %1358 = vmatprep.subr.bf16.mxu0 %v1675_v3  ;;  %658 = vmatpush1.bf16.msra.mxu1 %v1510_v27 }
  0x7b   : > { %659 = vmatprep.subr.bf16.mxu1 %v1512_v28 }
  0x7d   : > { %1359 = vmatpush3.bf16.msra.mxu0 %v1483_v19  ;;  %v503_v19 = vshrl.u32 %v502_v18, 7 }
  0x7e   : > { %1364 = vmatprep.subr.bf16.mxu0 %v1675_v3  ;;  %660 = vmatpush1.bf16.msra.mxu1 %v1514_v30 }
  0x7f   : > { %904 = vmatprep.subr.bf16.mxu1 %v1518_v37  ;;  %v504_v20 = vsub.s32 0, %v503_v19  ;;  %v508_v23 = vsub.s32 1, %v503_v19 }
  0x80   : > { %1361 = vmatmul.mubr.bf16.vlgmr.msra.gmra.mrb[0].mxu0 %v361_v26 }
  0x81   : > { %1365 = vmatpush3.bf16.msra.mxu0 %v1487_v25  ;;  %1380 = vmatprep.mubr.msk.bf16.mxu0 %vm1676_vm0, %v1675_v3  ;;  %v505_v24 = vrot.slane %v500_v22, %v504_v20  ;;  %v764_v25 = vrot.slane %v759_v21, %v504_v20  ;;  %v509_v26 = vrot.slane %v500_v22, %v508_v23 }
  0x82   : > { %1366 = vmatprep.subr.bf16.mxu0 %v1675_v3  ;;  %v768_v27 = vrot.slane %v759_v21, %v508_v23 }
  0x83   : > { %v1424_v28 = vadd.f32 %v764_v25, %v505_v24 }
  0x84   : > { %v1426_v30 = vadd.f32 %v768_v27, %v509_v26 }
  0x85   : > { %1367 = vmatpush3.bf16.msra.mxu0 %v1491_v29 }
  0x86   : > { %1368 = vmatprep.subr.bf16.mxu0 %v1675_v3 }
  0x89   : > { %1369 = vmatpush3.bf16.msra.mxu0 %v1495_v31 }
  0x8a   : > { %1370 = vmatprep.subr.bf16.mxu0 %v1675_v3 }
  0x8d   : > { %1371 = vmatpush3.bf16.msra.mxu0 %v1499_v32 }
  0x8e   : > { %1372 = vmatprep.subr.bf16.mxu0 %v1675_v3 }
  0x91   : > { %1373 = vmatpush3.bf16.msra.mxu0 %v1503_v33 }
  0x92   : > { %1374 = vmatprep.subr.bf16.mxu0 %v1675_v3 }
  0x95   : > { %1375 = vmatpush3.bf16.msra.mxu0 %v1507_v34 }
  0x96   : > { %1376 = vmatprep.subr.bf16.mxu0 %v1675_v3 }
  0x99   : > { %1377 = vmatpush3.bf16.msra.mxu0 %v1511_v35 }
  0x9a   : > { %1378 = vmatprep.subr.bf16.mxu0 %v1675_v3 }
  0x9d   : > { %1379 = vmatpush3.bf16.msra.mxu0 %v1515_v36 }
  0x9e   : > { %1384 = vmatprep.subr.bf16.mxu0 %v1675_v3 }
 0x153   : > { %v460_v39 = vpop.f32.mrb[0].mxu0 }
 0x154   : > { %v466_v42 = vpack.c.bf16 %v460_v39, %v460_v39  ;;  %v1362_v43 = vpop.f32.mrb[1].mxu0 }
 0x155   : > { %v463_v45 = vpop.f32.mrb[2].mxu0 }
 0x156   : > { %v1363_v46 = vpop.f32.mrb[3].mxu0  ;;  %678 = vmatmul.mubr.bf16.vlgmr.msra.gmra.mrb[0].mxu1 %v466_v42  ;;  %1381 = vmatmul.mubr.bf16.vlgmr.msra.gmra.mrb[4].mxu0 %v466_v42 }
 0x157   : > { %905 = vmatpush1.bf16.msra.mxu1 %v1516_v40  ;;  %1385 = vmatpush3.bf16.msra.mxu0 %v1537_v41 }
 0x158   : > { %906 = vmatprep.subr.bf16.mxu1 %v1521_v44  ;;  %1386 = vmatprep.subr.bf16.mxu0 %v1675_v3  ;;  %v512_v44 = vsub.s32 2, %v503_v19 }
 0x159   : > { %936 = vmatprep.mubr.bf16.mxu1 %v1677_v38  ;;  %1400 = vmatprep.mubr.msk.bf16.mxu0 %vm1676_vm0, %v1675_v3 }
 0x15a   : > { %v772_v45 = vrot.slane %v759_v21, %v512_v44 }
 0x15b   : > { %907 = vmatpush1.bf16.msra.mxu1 %v1519_v47  ;;  %1387 = vmatpush3.bf16.msra.mxu0 %v1541_v48  ;;  %v513_v47 = vrot.slane %v500_v22, %v512_v44 }
 0x15c   : > { %908 = vmatprep.subr.bf16.mxu1 %v1524_v49  ;;  %1388 = vmatprep.subr.bf16.mxu0 %v1675_v3 }
 0x15f   : > { %909 = vmatpush1.bf16.msra.mxu1 %v1522_v50  ;;  %1389 = vmatpush3.bf16.msra.mxu0 %v1542_v51 }
 0x160   : > { %910 = vmatprep.subr.bf16.mxu1 %v1527_v52  ;;  %1390 = vmatprep.subr.bf16.mxu0 %v1675_v3 }
 0x163   : > { %911 = vmatpush1.bf16.msra.mxu1 %v1525_v53  ;;  %1391 = vmatpush3.bf16.msra.mxu0 %v1543_v54 }
 0x164   : > { %912 = vmatprep.subr.bf16.mxu1 %v1530_v55  ;;  %1392 = vmatprep.subr.bf16.mxu0 %v1675_v3 }
 0x167   : > { %913 = vmatpush1.bf16.msra.mxu1 %v1528_v56  ;;  %1393 = vmatpush3.bf16.msra.mxu0 %v1544_v57 }
 0x168   : > { %914 = vmatprep.subr.bf16.mxu1 %v1533_v58  ;;  %1394 = vmatprep.subr.bf16.mxu0 %v1675_v3 }
 0x16b   : > { %915 = vmatpush1.bf16.msra.mxu1 %v1531_v59  ;;  %1395 = vmatpush3.bf16.msra.mxu0 %v1545_v60 }
 0x16c   : > { %916 = vmatprep.subr.bf16.mxu1 %v1536_v61  ;;  %1396 = vmatprep.subr.bf16.mxu0 %v1675_v3  ;;  %v1120_v61 = vand.u32 127, %v502_v18 }
 0x16e   : > { %vm1121_vm1 = vcmp.lt.s32.totalorder %v1120_v61, 16 }
 0x16f   : > { %917 = vmatpush1.bf16.msra.mxu1 %v1534_v62  ;;  %1397 = vmatpush3.bf16.msra.mxu0 %v1546_v63  ;;  %v1296_v62 = vld [vmem:[#allocation8] ss:$0 sm:$0xff] }
 0x170   : > { %918 = vmatprep.subr.bf16.mxu1 %v1540_v0  ;;  %1398 = vmatprep.subr.bf16.mxu0 %v1675_v3 }
 0x173   : > { %919 = vmatpush1.bf16.msra.mxu1 %v1538_v1  ;;  %1399 = vmatpush3.bf16.msra.mxu0 %v1547_v4 }
 0x174   : > { %1404 = vmatprep.subr.bf16.mxu1 %v1675_v3 }
 0x176   : > { %937 = vmatmul.mubr.bf16.vlgmr.msra.gmra.mrb[0].mxu1 %v726_v5  ;;  %1401 = vmatmul.mubr.bf16.vlgmr.msra.gmra.mrb[8].mxu0 %v726_v5 }
 0x177   : > { %1420 = vmatprep.mubr.msk.bf16.mxu1 %vm1676_vm0, %v1675_v3  ;;  %1405 = vmatpush3.bf16.msra.mxu1 %v1548_v6 }
 0x178   : > { %1406 = vmatprep.subr.bf16.mxu1 %v1675_v3 }
 0x17b   : > { %1407 = vmatpush3.bf16.msra.mxu1 %v1549_v7 }
 0x17c   : > { %1408 = vmatprep.subr.bf16.mxu1 %v1675_v3 }
 0x17f   : > { %1409 = vmatpush3.bf16.msra.mxu1 %v1550_v8 }
 0x180   : > { %1410 = vmatprep.subr.bf16.mxu1 %v1675_v3 }
 0x183   : > { %1411 = vmatpush3.bf16.msra.mxu1 %v1551_v9 }
 0x184   : > { %1412 = vmatprep.subr.bf16.mxu1 %v1675_v3 }
 0x187   : > { %1413 = vmatpush3.bf16.msra.mxu1 %v1552_v10 }
 0x188   : > { %1414 = vmatprep.subr.bf16.mxu1 %v1675_v3 }
 0x18b   : > { %1415 = vmatpush3.bf16.msra.mxu1 %v1553_v11 }
 0x18c   : > { %1416 = vmatprep.subr.bf16.mxu1 %v1675_v3 }
 0x18f   : > { %1417 = vmatpush3.bf16.msra.mxu1 %v1554_v12 }
 0x190   : > { %1418 = vmatprep.subr.bf16.mxu1 %v1675_v3 }
 0x193   : > { %1419 = vmatpush3.bf16.msra.mxu1 %v1555_v13 }
 0x229   : > { %v720_v14 = vpop.f32.mrb[4].mxu0 }
 0x22a   : > { %v1382_v15 = vpop.f32.mrb[5].mxu0  ;;  %v721_v51 = vadd.f32 %v720_v14, %v513_v47 }
 0x22b   : > { %v723_v16 = vpop.f32.mrb[6].mxu0 }
 0x22c   : > { %v1383_v17 = vpop.f32.mrb[7].mxu0 }
 0x249   : > { %v938_v29 = vpop.f32.mrb[0].mxu1  ;;  %v979_v31 = vpop.f32.mrb[8].mxu0 }
 0x24a   : > { %v1425_v32 = vadd.f32 %v1424_v28, %v938_v29  ;;  %v940_v33 = vpop.f32.mrb[1].mxu1  ;;  %v1402_v34 = vpop.f32.mrb[9].mxu0  ;;  %v980_v49 = vadd.f32 %v979_v31, %v772_v45 }
 0x24b   : > { %v942_v35 = vpop.f32.mrb[2].mxu1  ;;  %v982_v36 = vpop.f32.mrb[10].mxu0  ;;  %v1427_v40 = vadd.f32 %v1426_v30, %v940_v33 }
 0x24c   : > { %v1294_v37 = vmul.f32 -1.442695, %v1425_v32  ;;  %v943_v38 = vpop.f32.mrb[3].mxu1  ;;  %v1403_v39 = vpop.f32.mrb[11].mxu0 }
 0x24d   : > { %v1295_v41 = vmul.f32 -1.442695, %v1427_v40 }
 0x24e   : > { %1556 = vpow2.f32 %v1294_v37 }
 0x24f   : > { %1558 = vpow2.f32 %v1295_v41 }
 0x258   : > { %v1557_v42 = vpop.eup %1556 }
 0x259   : > { %v989_v43 = vadd.f32 1.0, %v1557_v42  ;;  %v1559_v46 = vpop.eup %1558 }
 0x25a   : > { %v996_v48 = vadd.f32 1.0, %v1559_v46 }
 0x25b   : > { %1560 = vrcp.f32 %v989_v43 }
 0x25c   : > { %1562 = vrcp.f32 %v996_v48 }
 0x265   : > { %v1561_v50 = vpop.eup %1560 }
 0x266   : > { %v999_v52 = vmul.f32 %v1561_v50, %v980_v49  ;;  %v1563_v54 = vpop.eup %1562 }
 0x267   : > { %v1002_v55 = vsub.f32 1.0, %v1563_v54  ;;  %v1004_v58 = vmul.f32 %v1563_v54, %v2054_v2 }
 0x268   : > { %v1000_v53 = vadd.f32 %v999_v52, %v721_v51 }
 0x26a   : > { %1564 = vtanh.f32 %v1000_v53 }
 0x274   : > { %v1565_v56 = vpop.eup %1564 }
 0x275   : > { %v1003_v57 = vmul.f32 %v1565_v56, %v1002_v55 }
 0x277   : > { %v1005_v59 = vadd.f32 %v1004_v58, %v1003_v57 }
 0x279   : > { %1006 = vst [vmem:[#allocation2] sm:$0xff] %v1005_v59  ;;  %v1007_v60 = vpack.c.bf16 %v1005_v59, %v1005_v59 }
 0x27b   : > { %1421 = vmatmul.mubr.bf16.vlgmr.msra.gmra.mrb[4].mxu1 %v1007_v60 }
 0x34e   : > { %v1113_v63 = vpop.f32.mrb[4].mxu1 }
 0x34f   : > { %v1114_v0 = vadd.f32 %v1296_v62, %v1113_v63  ;;  %v1422_v1 = vpop.f32.mrb[5].mxu1 }
 0x350   : > { %v1116_v4 = vpop.f32.mrb[6].mxu1 }
 0x351   : > { %v1423_v5 = vpop.f32.mrb[7].mxu1  ;;  %v1122_v6 = vsel %vm1121_vm1, %v1114_v0, -1e+30 }
 0x352   : > { %1123 = vmax.xlane.f32.xlu0 %v1122_v6 }
 0x3df   : > { %v1124_v7 = vpop.xlane.xlu0 %1123 }
 0x3e0   : > { %v1125_v8 = vsub.f32 %v1122_v6, %v1124_v7  ;;  %vm1134_vm2 = vcmp.eq.f32.partialorder %v1122_v6, %v1124_v7 }
 0x3e1   : > { %v1135_v9 = vsel %vm1134_vm2, %v1120_v61, 128 }
 0x3e2   : > { %v1137_v10 = vshra.s32 %v1135_v9, 16  ;;  %v1126_v2 = vmul.f32 1.442695, %v1125_v8  ;;  %v1136_v13 = vand.u32 65535, %v1135_v9 }
 0x3e4   : > { %v1139_v11 = vcvt.s32.f32 %v1137_v10  ;;  %1566 = vpow2.f32 %v1126_v2  ;;  %v1138_v15 = vcvt.s32.f32 %v1136_v13 }
 0x3e6   : > { %1140 = vmin.xlane.f32.xlu0 %v1139_v11 }
 0x3ee   : > { %v1567_v12 = vpop.eup %1566 }
 0x3ef   : > { %1128 = vadd.xlane.f32.xlu1 %v1567_v12 }
 0x473   : > { %v1141_v14 = vpop.xlane.xlu0 %1140 }
 0x474   : > { %vm1142_vm3 = vcmp.eq.f32.partialorder %v1139_v11, %v1141_v14  ;;  %v1147_v21 = vcvt.f32.s32 %v1141_v14 }
 0x475   : > { %v1143_v16 = vsel %vm1142_vm3, %v1138_v15, inf }
 0x476   : > { %1144 = vmin.xlane.f32.xlu1 %v1143_v16  ;;  %v1148_v23 = vshll.u32 %v1147_v21, 16 }
 0x47c   : > { %v1129_v17 = vpop.xlane.xlu1 %1128 }
 0x47d   : > { %1568 = vlog2.f32 %v1129_v17 }
 0x487   : > { %v1569_v18 = vpop.eup %1568 }
 0x488   : > { %v1131_v19 = vmul.f32 0.6931472, %v1569_v18 }
 0x48a   : > { %v1132_v20 = vsub.f32 %v1125_v8, %v1131_v19 }
 0x48c   : > { %1133 = vst [vmem:[%s1850_s11] sm:$0xff] %v1132_v20 }
 0x503   : > { %v1145_v22 = vpop.xlane.xlu1 %1144 }
 0x504   : > { %v1146_v24 = vcvt.f32.s32 %v1145_v22 }
 0x506   : > { %v1149_v25 = vadd.s32 %v1148_v23, %v1146_v24 }
 0x508   : > { %vm1150_vm4 = vcmp.eq.s32.totalorder %v1120_v61, %v1149_v25 }
 0x509   : > { %v1305_v26 = vsel %vm1150_vm4, 1.0, %v1675_v3 }
 0x50a   : > { %1153 = vst [vmem:[#allocation3] sm:$0xff] %v1305_v26 }
 0x50b PF: > { %s21_s30 = sadd.s32 1, %s1668_s30  }
 0x50c   : > { %p18_p3 = scmp.ge.s32.totalorder %s21_s30, 9  }
 0x50e   :  { %20 = sbr.rel (!%p18_p3) target bundleno = 2 (0x2), region = 100 }
 0x515   :  { %1173 = vsyncpa [#allocation5], 1 }
 0x516   :  { %1175 = vsyncpa [#allocation5 + $0x1], 1 }
 0x517   :  { %1176 = vsyncpa [#allocation7], 1 }

</bundles_post_ra>
